<compile_context>
chip_gen: v7x
topology: tpu7x:2x2x1
jax: 0.10.0
libtpu: 0.0.40
codegen_flags: <defaults>
</compile_context>

<pallas_src>
import functools

import jax
import jax.numpy as jnp
import numpy as np
from jax.experimental import pallas as pl
from jax.experimental.pallas import tpu as pltpu

ACT_DTYPE = jnp.bfloat16
_BN_EPS = 1e-5


# ----------------------------------------------------------------------------
# small helpers
# ----------------------------------------------------------------------------
def _round_up(x, m):
    return (x + m - 1) // m * m


def _pick(n, cands):
    """Largest candidate tile that divides n, else the full dim."""
    for c in cands:
        if n >= c and n % c == 0:
            return c
    return n


def _pick_tk(k):
    """K tile: full K when small, else largest 128-multiple divisor <= 1024."""
    if k <= 1024:
        return k
    for tk in range(1024, 0, -128):
        if k % tk == 0:
            return tk
    return k


def _bn_fold(bn):
    scale = bn["gamma"] / jnp.sqrt(bn["var"] + _BN_EPS)
    bias = bn["beta"] - bn["mean"] * scale
    return scale, bias


# ----------------------------------------------------------------------------
# Kernel 1: tiled GEMM with K-reduction axis + fused BN / residual / ReLU
# epilogue, optional raw (pre-BN) second output for the hooked convs.
# ----------------------------------------------------------------------------
def _gemm_bn_kernel(*refs, relu, has_res, emit_raw):
    a_ref, b_ref, s_ref, bias_ref = refs[:4]
    i = 4
    res_ref = refs[i] if has_res else None
    i += int(has_res)
    o_ref = refs[i]
    i += 1
    raw_ref = refs[i] if emit_raw else None
    i += int(emit_raw)
    acc_ref = refs[i]

    k = pl.program_id(2)
    nk = pl.num_programs(2)

    @pl.when(k == 0)
    def _():
        acc_ref[...] = jnp.zeros_like(acc_ref)

    acc_ref[...] += jnp.dot(a_ref[...], b_ref[...],
                            preferred_element_type=jnp.float32)

    @pl.when(k == nk - 1)
    def _():
        acc = acc_ref[...]
        if emit_raw:                       # hook fires on the raw conv output
            raw_ref[...] = acc
        y = acc * s_ref[...] + bias_ref[...]
        if has_res:
            y = y + res_ref[...].astype(jnp.float32)
        if relu:
            y = jnp.maximum(y, 0.0)
        o_ref[...] = y.astype(o_ref.dtype)


def conv_gemm(a, b, scale, bias, *, relu, residual=None, emit_raw=False):
    """(M,K)x(K,N) GEMM + per-channel scale/bias (+residual)(+ReLU) epilogue.

    a, b, residual are bf16; scale/bias are f32.
    Returns (activated bf16 (M,N), raw f32 (M,N) or None).
    """
    M, K = a.shape
    K2, N = b.shape
    assert K == K2
    if K > 128 and K % 128 != 0:           # stem conv: K=147 -> 256 (MXU-aligned)
        kp = _round_up(K, 128)
        a = jnp.pad(a, ((0, 0), (0, kp - K)))
        b = jnp.pad(b, ((0, kp - K), (0, 0)))
        K = kp

    tm = _pick(M, (512, 256, 128))
    tn = _pick(N, (256, 128))
    tk = _pick_tk(K)

    inputs = [a, b,
              scale.reshape(1, N).astype(jnp.float32),
              bias.reshape(1, N).astype(jnp.float32)]
    in_specs = [pl.BlockSpec((tm, tk), lambda i, j, k: (i, k)),
                pl.BlockSpec((tk, tn), lambda i, j, k: (k, j)),
                pl.BlockSpec((1, tn), lambda i, j, k: (0, j)),
                pl.BlockSpec((1, tn), lambda i, j, k: (0, j))]
    if residual is not None:
        inputs.append(residual)
        in_specs.append(pl.BlockSpec((tm, tn), lambda i, j, k: (i, j)))

    out_shape = [jax.ShapeDtypeStruct((M, N), ACT_DTYPE)]
    out_specs = [pl.BlockSpec((tm, tn), lambda i, j, k: (i, j))]
    if emit_raw:
        out_shape.append(jax.ShapeDtypeStruct((M, N), jnp.float32))
        out_specs.append(pl.BlockSpec((tm, tn), lambda i, j, k: (i, j)))

    kernel = functools.partial(_gemm_bn_kernel, relu=relu,
                               has_res=residual is not None, emit_raw=emit_raw)
    outs = pl.pallas_call(
        kernel,
        out_shape=out_shape,
        grid=(M // tm, N // tn, K // tk),
        in_specs=in_specs,
        out_specs=out_specs,
        scratch_shapes=[pltpu.VMEM((tm, tn), jnp.float32)],
        compiler_params=pltpu.CompilerParams(
            dimension_semantics=("parallel", "parallel", "arbitrary")),
    )(*inputs)
    if emit_raw:
        return outs[0], outs[1]
    return outs[0], None


# ----------------------------------------------------------------------------
# Kernel 2: fused stride-1 / pad-1 3x3 conv + BN(+ReLU), no materialised im2col.
# The zero-padded input (flattened (h,w) rows, lane/packing-aligned row width)
# stays resident in VMEM; the 9 taps are static row-shifted slices of one
# aligned slab load, accumulated in f32 on the MXU.
# ----------------------------------------------------------------------------
def _conv3x3_kernel(x_ref, w_ref, s_ref, b_ref, o_ref, *,
                    th, Wpp, W, Hp, slab_rows, relu):
    n = pl.program_id(0)
    hb = pl.program_id(1)
    tn = o_ref.shape[-1]

    base = pl.multiple_of((n * Hp + hb * th) * Wpp, 16)
    slab = x_ref[pl.ds(base, slab_rows), :]          # one aligned haloed load

    acc = jnp.zeros((th * Wpp, tn), jnp.float32)
    for t in range(9):                               # static unrolled taps
        dy, dx = t // 3, t % 3
        off = dy * Wpp + dx
        a = slab[off:off + th * Wpp, :]
        acc = acc + jnp.dot(a, w_ref[t], preferred_element_type=jnp.float32)

    y = acc * s_ref[...] + b_ref[...]
    if relu:
        y = jnp.maximum(y, 0.0)
    y = y.astype(o_ref.dtype).reshape(th, Wpp, tn)[:, :W, :]
    o_ref[...] = y[None]


def conv3x3_s1_fused(x, w, scale, bias, *, relu=True):
    N, H, W, Cin = x.shape
    Cout = w.shape[-1]
    Hp = H + 2
    Wpp = _round_up(W + 2, 16)                       # aligned padded row width
    xp = jnp.pad(x, ((0, 0), (1, 1), (1, Wpp - W - 1), (0, 0)))
    xflat = jnp.pad(xp.reshape(N * Hp * Wpp, Cin), ((0, 16), (0, 0)))

    tn = _pick(Cout, (256, 128))
    th = H
    while th * Wpp > 4096 and th % 2 == 0:           # keep the M-tile reasonable
        th //= 2
    slab_rows = (th + 2) * Wpp + 16

    kernel = functools.partial(_conv3x3_kernel, th=th, Wpp=Wpp, W=W, Hp=Hp,
                               slab_rows=slab_rows, relu=relu)
    return pl.pallas_call(
        kernel,
        out_shape=jax.ShapeDtypeStruct((N, H, W, Cout), ACT_DTYPE),
        grid=(N, H // th, Cout // tn),
        in_specs=[
            pl.BlockSpec(xflat.shape, lambda n, h, j: (0, 0)),     # resident
            pl.BlockSpec((9, Cin, tn), lambda n, h, j: (0, 0, j)),
            pl.BlockSpec((1, tn), lambda n, h, j: (0, j)),
            pl.BlockSpec((1, tn), lambda n, h, j: (0, j)),
        ],
        out_specs=pl.BlockSpec((1, th, W, tn), lambda n, h, j: (n, h, 0, j)),
        compiler_params=pltpu.CompilerParams(
            dimension_semantics=("parallel", "parallel", "parallel")),
    )(xflat, w.reshape(9, Cin, Cout),
      scale.reshape(1, Cout).astype(jnp.float32),
      bias.reshape(1, Cout).astype(jnp.float32))


# ----------------------------------------------------------------------------
# Conv wrappers (layout glue in XLA, all math in the Pallas kernels above)
# ----------------------------------------------------------------------------
def conv1x1(x, w, scale, bias, *, stride=1, relu, residual=None, emit_raw=False):
    if stride != 1:
        x = x[:, ::stride, ::stride, :]
    N, H, W, Cin = x.shape
    Cout = w.shape[-1]
    res2d = None if residual is None else residual.reshape(-1, Cout)
    y, raw = conv_gemm(x.reshape(-1, Cin), w.reshape(Cin, Cout), scale, bias,
                       relu=relu, residual=res2d, emit_raw=emit_raw)
    y = y.reshape(N, H, W, Cout)
    raw = None if raw is None else raw.reshape(N, H, W, Cout)
    return y, raw


def conv_im2col(x, w, scale, bias, *, stride, padding, relu, emit_raw=False):
    # TODO(synk): only the 7x7 stem and the three stride-2 3x3 convs still use
    # this materialised-im2col path; every stride-1 3x3 conv goes through the
    # fused in-VMEM shifted-matmul kernel (no HBM patch blow-up).
    N, H, W, Cin = x.shape
    KH, KW, _, Cout = w.shape
    Ho = (H + 2 * padding - KH) // stride + 1
    Wo = (W + 2 * padding - KW) // stride + 1
    xp = jnp.pad(x, ((0, 0), (padding, padding), (padding, padding), (0, 0)))
    cols = [xp[:, dy:dy + stride * Ho:stride, dx:dx + stride * Wo:stride, :]
            for dy in range(KH) for dx in range(KW)]
    patches = jnp.stack(cols, axis=3).reshape(N * Ho * Wo, KH * KW * Cin)
    y, raw = conv_gemm(patches, w.reshape(KH * KW * Cin, Cout), scale, bias,
                       relu=relu, emit_raw=emit_raw)
    y = y.reshape(N, Ho, Wo, Cout)
    raw = None if raw is None else raw.reshape(N, Ho, Wo, Cout)
    return y, raw


def maxpool_3x3_s2_p1(x):
    # TODO(synk): one-off 3x3/stride-2 max pool kept as XLA glue (negligible
    # next to the conv GEMMs).
    N, H, W, C = x.shape
    Ho = (H + 2 - 3) // 2 + 1
    Wo = (W + 2 - 3) // 2 + 1
    xp = jnp.pad(x, ((0, 0), (1, 1), (1, 1), (0, 0)),
                 constant_values=-jnp.inf)
    cols = [xp[:, dy:dy + 2 * Ho:2, dx:dx + 2 * Wo:2, :]
            for dy in range(3) for dx in range(3)]
    return jnp.max(jnp.stack(cols, axis=0), axis=0)


# ----------------------------------------------------------------------------
# Deterministic synthetic ResNet-50 parameters
# ----------------------------------------------------------------------------
_LAYER_CFG = [(64, 3, 1), (128, 4, 2), (256, 6, 2), (512, 3, 2)]


def init_resnet50_params(key):
    counter = [0]

    def convw(kh, kw, cin, cout):
        counter[0] += 1
        k = jax.random.fold_in(key, counter[0])
        fan_in = kh * kw * cin
        w = jax.random.normal(k, (kh, kw, cin, cout), jnp.float32)
        return (w * np.float32(np.sqrt(2.0 / fan_in))).astype(ACT_DTYPE)

    def bn(c):
        return {"gamma": jnp.ones((c,), jnp.float32),
                "beta": jnp.zeros((c,), jnp.float32),
                "mean": jnp.zeros((c,), jnp.float32),
                "var": jnp.ones((c,), jnp.float32)}

    params = {"conv1": convw(7, 7, 3, 64), "bn1": bn(64), "layers": []}
    cin = 64
    for width, nblocks, stride in _LAYER_CFG:
        cout = width * 4
        layer = []
        for bi in range(nblocks):
            s = stride if bi == 0 else 1
            blk = {"w1": convw(1, 1, cin, width), "bn1": bn(width),
                   "w2": convw(3, 3, width, width), "bn2": bn(width),
                   "w3": convw(1, 1, width, cout), "bn3": bn(cout)}
            if s != 1 or cin != cout:
                blk["wd"] = convw(1, 1, cin, cout)
                blk["bnd"] = bn(cout)
            layer.append(blk)
            cin = cout
        params["layers"].append(layer)
    return params


# ----------------------------------------------------------------------------
# Forward: returns the 5 hooked (pre-BN) conv outputs, like MyResnet50.forward
# ----------------------------------------------------------------------------
def _bottleneck(x, p, stride, capture):
    s1, b1 = _bn_fold(p["bn1"])
    out, _ = conv1x1(x, p["w1"], s1, b1, relu=True)            # conv1+bn1+relu

    s2, b2 = _bn_fold(p["bn2"])
    if stride == 1:
        out = conv3x3_s1_fused(out, p["w2"], s2, b2, relu=True)  # conv2+bn2+relu
    else:
        out, _ = conv_im2col(out, p["w2"], s2, b2, stride=stride, padding=1,
                             relu=True)

    if "wd" in p:
        sd, bd = _bn_fold(p["bnd"])
        identity, _ = conv1x1(x, p["wd"], sd, bd, stride=stride, relu=False)
    else:
        identity = x

    s3, b3 = _bn_fold(p["bn3"])
    # conv3 + bn3 + residual add + relu fused; raw (pre-BN) conv3 output is the
    # hooked side tensor for the last block of each layer.
    out, raw = conv1x1(out, p["w3"], s3, b3, relu=True,
                       residual=identity, emit_raw=capture)
    return out, raw


def resnet50_side_forward(x_nchw, params):
    x = jnp.transpose(x_nchw, (0, 2, 3, 1)).astype(ACT_DTYPE)   # NCHW -> NHWC
    sides = []

    s1, b1 = _bn_fold(params["bn1"])
    h, raw = conv_im2col(x, params["conv1"], s1, b1, stride=2, padding=3,
                         relu=True, emit_raw=True)
    sides.append(raw)                                 # side 0: raw conv1 (f32)
    h = maxpool_3x3_s2_p1(h)

    for (width, nblocks, stride), layer in zip(_LAYER_CFG, params["layers"]):
        for bi, blk in enumerate(layer):
            s = stride if bi == 0 else 1
            h, side = _bottleneck(h, blk, s, capture=(bi == nblocks - 1))
            if side is not None:
                sides.append(side)                    # sides 1..4

    # NOTE: the reference forward also runs avgpool+fc but discards the result;
    # only the hooked side tensors are returned.
    return [jnp.transpose(s, (0, 3, 1, 2)) for s in sides]       # NHWC -> NCHW


# ----------------------------------------------------------------------------
# Demo / self-checks
# ----------------------------------------------------------------------------
if __name__ == "__main__":
    key = jax.random.PRNGKey(0)
    kx, kp, kt = jax.random.split(key, 3)

    # --- unit checks of the two fused conv kernels vs. plain-JAX f32 refs ---
    def conv_ref(x, w, stride, padding):
        return jax.lax.conv_general_dilated(
            x.astype(jnp.float32), w.astype(jnp.float32),
            window_strides=(stride, stride),
            padding=[(padding, padding)] * 2,
            dimension_numbers=("NHWC", "HWIO", "NHWC"),
            precision=jax.lax.Precision.HIGHEST)

    k1, k2, k3, k4 = jax.random.split(kt, 4)
    xt = jax.random.normal(k1, (2, 16, 16, 64), jnp.float32).astype(ACT_DTYPE)
    wt = (jax.random.normal(k2, (3, 3, 64, 128), jnp.float32)
          * np.float32(np.sqrt(2.0 / 576))).astype(ACT_DTYPE)
    st = jax.random.uniform(k3, (128,), jnp.float32, 0.5, 1.5)
    bt = jax.random.normal(k4, (128,), jnp.float32) * 0.1
    got = conv3x3_s1_fused(xt, wt, st, bt, relu=True).astype(jnp.float32)
    want = jnp.maximum(conv_ref(xt, wt, 1, 1) * st + bt, 0.0)
    np.testing.assert_allclose(np.asarray(got), np.asarray(want),
                               rtol=5e-2, atol=5e-2)

    wt1 = (jax.random.normal(k2, (1, 1, 64, 256), jnp.float32)
           * np.float32(np.sqrt(2.0 / 64))).astype(ACT_DTYPE)
    st1 = jax.random.uniform(k3, (256,), jnp.float32, 0.5, 1.5)
    bt1 = jax.random.normal(k4, (256,), jnp.float32) * 0.1
    res = jax.random.normal(k1, (2, 16, 16, 256), jnp.float32).astype(ACT_DTYPE)
    got_y, got_raw = conv1x1(xt, wt1, st1, bt1, relu=True,
                             residual=res, emit_raw=True)
    raw_ref = conv_ref(xt, wt1, 1, 0)
    y_ref = jnp.maximum(raw_ref * st1 + bt1 + res.astype(jnp.float32), 0.0)
    np.testing.assert_allclose(np.asarray(got_raw), np.asarray(raw_ref),
                               rtol=5e-2, atol=5e-2)
    np.testing.assert_allclose(np.asarray(got_y.astype(jnp.float32)),
                               np.asarray(y_ref), rtol=5e-2, atol=5e-2)

    # --- full forward: batch=2, 3x64x64 input (NCHW, like the PyTorch module) ---
    B, H = 2, 64
    x = jax.random.normal(kx, (B, 3, H, H), jnp.float32)
    params = init_resnet50_params(kp)

    sides = jax.jit(resnet50_side_forward)(x, params)
    sides = jax.block_until_ready(sides)

    expected = [(B, 64, H // 2, H // 2),
                (B, 256, H // 4, H // 4),
                (B, 512, H // 8, H // 8),
                (B, 1024, H // 16, H // 16),
                (B, 2048, H // 32, H // 32)]
    assert [tuple(s.shape) for s in sides] == expected, \
        [tuple(s.shape) for s in sides]
    assert all(bool(jnp.all(jnp.isfinite(s))) for s in sides)

    print("KERNEL_OK")
</pallas_src>

<mosaic_0001>
module attributes {stable_mosaic.version = 11 : i64} {
  func.func @_conv3x3_kernel(%arg0: i32, %arg1: i32, %arg2: i32, %arg3: memref<1168x64xbf16, #tpu.memory_space<vmem>>, %arg4: memref<9x64x128xbf16, #tpu.memory_space<vmem>>, %arg5: memref<1x128xf32, #tpu.memory_space<vmem>>, %arg6: memref<1x128xf32, #tpu.memory_space<vmem>>, %arg7: memref<1x16x16x128xbf16, #tpu.memory_space<vmem>>) attributes {dimension_semantics = [#tpu.dimension_semantics<parallel>, #tpu.dimension_semantics<parallel>, #tpu.dimension_semantics<parallel>], iteration_bounds = array<i64: 2, 1, 1>, scalar_prefetch = 0 : i64, scratch_operands = 0 : i64, tpu.core_type = #tpu.core_type<tc>, window_params = [{pipeline_mode = #tpu.pipeline_mode<synchronous>, transform_indices = @transform_0, window_bounds = array<i64: 1168, 64>}, {transform_indices = @transform_1, window_bounds = array<i64: 9, 64, 128>}, {transform_indices = @transform_2, window_bounds = array<i64: 1, 128>}, {transform_indices = @transform_3, window_bounds = array<i64: 1, 128>}, {transform_indices = @transform_4, window_bounds = array<i64: 1, 16, 16, 128>}]} {
    %c18_i32 = arith.constant 18 : i32
    %0 = arith.muli %arg0, %c18_i32 : i32
    %c16_i32 = arith.constant 16 : i32
    %1 = arith.muli %arg1, %c16_i32 : i32
    %2 = arith.addi %0, %1 : i32
    %c32_i32 = arith.constant 32 : i32
    %3 = arith.muli %2, %c32_i32 : i32
    %4 = tpu.assume_multiple %3, 16 : i32
    %5 = arith.index_cast %4 : i32 to index
    %c0 = arith.constant 0 : index
    %6 = vector.load %arg3[%5, %c0] : memref<1168x64xbf16, #tpu.memory_space<vmem>>, vector<592x64xbf16>
    %cst = arith.constant 0.000000e+00 : f32
    %7 = vector.broadcast %cst : f32 to vector<512x128xf32>
    %8 = vector.extract_strided_slice %6 {offsets = [0, 0], sizes = [512, 64], strides = [1, 1]} : vector<592x64xbf16> to vector<512x64xbf16>
    %c0_0 = arith.constant 0 : index
    %c0_1 = arith.constant 0 : index
    %c0_2 = arith.constant 0 : index
    %9 = vector.load %arg4[%c0_0, %c0_1, %c0_2] : memref<9x64x128xbf16, #tpu.memory_space<vmem>>, vector<1x64x128xbf16>
    %10 = vector.shape_cast %9 : vector<1x64x128xbf16> to vector<64x128xbf16>
    %cst_3 = arith.constant dense<0.000000e+00> : vector<512x128xf32>
    %11 = tpu.matmul %8, %10, %cst_3 {dimension_numbers = #tpu.dot_dimension_numbers<[1], [0], [0], [1], [0, 0, 1, 1], [], []>} : vector<512x64xbf16>, vector<64x128xbf16>, vector<512x128xf32> -> vector<512x128xf32>
    %12 = arith.addf %7, %11 : vector<512x128xf32>
    %13 = vector.extract_strided_slice %6 {offsets = [1, 0], sizes = [512, 64], strides = [1, 1]} : vector<592x64xbf16> to vector<512x64xbf16>
    %c1 = arith.constant 1 : index
    %c0_4 = arith.constant 0 : index
    %c0_5 = arith.constant 0 : index
    %14 = vector.load %arg4[%c1, %c0_4, %c0_5] : memref<9x64x128xbf16, #tpu.memory_space<vmem>>, vector<1x64x128xbf16>
    %15 = vector.shape_cast %14 : vector<1x64x128xbf16> to vector<64x128xbf16>
    %cst_6 = arith.constant dense<0.000000e+00> : vector<512x128xf32>
    %16 = tpu.matmul %13, %15, %cst_6 {dimension_numbers = #tpu.dot_dimension_numbers<[1], [0], [0], [1], [0, 0, 1, 1], [], []>} : vector<512x64xbf16>, vector<64x128xbf16>, vector<512x128xf32> -> vector<512x128xf32>
    %17 = arith.addf %12, %16 : vector<512x128xf32>
    %18 = vector.extract_strided_slice %6 {offsets = [2, 0], sizes = [512, 64], strides = [1, 1]} : vector<592x64xbf16> to vector<512x64xbf16>
    %c2 = arith.constant 2 : index
    %c0_7 = arith.constant 0 : index
    %c0_8 = arith.constant 0 : index
    %19 = vector.load %arg4[%c2, %c0_7, %c0_8] : memref<9x64x128xbf16, #tpu.memory_space<vmem>>, vector<1x64x128xbf16>
    %20 = vector.shape_cast %19 : vector<1x64x128xbf16> to vector<64x128xbf16>
    %cst_9 = arith.constant dense<0.000000e+00> : vector<512x128xf32>
    %21 = tpu.matmul %18, %20, %cst_9 {dimension_numbers = #tpu.dot_dimension_numbers<[1], [0], [0], [1], [0, 0, 1, 1], [], []>} : vector<512x64xbf16>, vector<64x128xbf16>, vector<512x128xf32> -> vector<512x128xf32>
    %22 = arith.addf %17, %21 : vector<512x128xf32>
    %23 = vector.extract_strided_slice %6 {offsets = [32, 0], sizes = [512, 64], strides = [1, 1]} : vector<592x64xbf16> to vector<512x64xbf16>
    %c3 = arith.constant 3 : index
    %c0_10 = arith.constant 0 : index
    %c0_11 = arith.constant 0 : index
    %24 = vector.load %arg4[%c3, %c0_10, %c0_11] : memref<9x64x128xbf16, #tpu.memory_space<vmem>>, vector<1x64x128xbf16>
    %25 = vector.shape_cast %24 : vector<1x64x128xbf16> to vector<64x128xbf16>
    %cst_12 = arith.constant dense<0.000000e+00> : vector<512x128xf32>
    %26 = tpu.matmul %23, %25, %cst_12 {dimension_numbers = #tpu.dot_dimension_numbers<[1], [0], [0], [1], [0, 0, 1, 1], [], []>} : vector<512x64xbf16>, vector<64x128xbf16>, vector<512x128xf32> -> vector<512x128xf32>
    %27 = arith.addf %22, %26 : vector<512x128xf32>
    %28 = vector.extract_strided_slice %6 {offsets = [33, 0], sizes = [512, 64], strides = [1, 1]} : vector<592x64xbf16> to vector<512x64xbf16>
    %c4 = arith.constant 4 : index
    %c0_13 = arith.constant 0 : index
    %c0_14 = arith.constant 0 : index
    %29 = vector.load %arg4[%c4, %c0_13, %c0_14] : memref<9x64x128xbf16, #tpu.memory_space<vmem>>, vector<1x64x128xbf16>
    %30 = vector.shape_cast %29 : vector<1x64x128xbf16> to vector<64x128xbf16>
    %cst_15 = arith.constant dense<0.000000e+00> : vector<512x128xf32>
    %31 = tpu.matmul %28, %30, %cst_15 {dimension_numbers = #tpu.dot_dimension_numbers<[1], [0], [0], [1], [0, 0, 1, 1], [], []>} : vector<512x64xbf16>, vector<64x128xbf16>, vector<512x128xf32> -> vector<512x128xf32>
    %32 = arith.addf %27, %31 : vector<512x128xf32>
    %33 = vector.extract_strided_slice %6 {offsets = [34, 0], sizes = [512, 64], strides = [1, 1]} : vector<592x64xbf16> to vector<512x64xbf16>
    %c5 = arith.constant 5 : index
    %c0_16 = arith.constant 0 : index
    %c0_17 = arith.constant 0 : index
    %34 = vector.load %arg4[%c5, %c0_16, %c0_17] : memref<9x64x128xbf16, #tpu.memory_space<vmem>>, vector<1x64x128xbf16>
    %35 = vector.shape_cast %34 : vector<1x64x128xbf16> to vector<64x128xbf16>
    %cst_18 = arith.constant dense<0.000000e+00> : vector<512x128xf32>
    %36 = tpu.matmul %33, %35, %cst_18 {dimension_numbers = #tpu.dot_dimension_numbers<[1], [0], [0], [1], [0, 0, 1, 1], [], []>} : vector<512x64xbf16>, vector<64x128xbf16>, vector<512x128xf32> -> vector<512x128xf32>
    %37 = arith.addf %32, %36 : vector<512x128xf32>
    %38 = vector.extract_strided_slice %6 {offsets = [64, 0], sizes = [512, 64], strides = [1, 1]} : vector<592x64xbf16> to vector<512x64xbf16>
    %c6 = arith.constant 6 : index
    %c0_19 = arith.constant 0 : index
    %c0_20 = arith.constant 0 : index
    %39 = vector.load %arg4[%c6, %c0_19, %c0_20] : memref<9x64x128xbf16, #tpu.memory_space<vmem>>, vector<1x64x128xbf16>
    %40 = vector.shape_cast %39 : vector<1x64x128xbf16> to vector<64x128xbf16>
    %cst_21 = arith.constant dense<0.000000e+00> : vector<512x128xf32>
    %41 = tpu.matmul %38, %40, %cst_21 {dimension_numbers = #tpu.dot_dimension_numbers<[1], [0], [0], [1], [0, 0, 1, 1], [], []>} : vector<512x64xbf16>, vector<64x128xbf16>, vector<512x128xf32> -> vector<512x128xf32>
    %42 = arith.addf %37, %41 : vector<512x128xf32>
    %43 = vector.extract_strided_slice %6 {offsets = [65, 0], sizes = [512, 64], strides = [1, 1]} : vector<592x64xbf16> to vector<512x64xbf16>
    %c7 = arith.constant 7 : index
    %c0_22 = arith.constant 0 : index
    %c0_23 = arith.constant 0 : index
    %44 = vector.load %arg4[%c7, %c0_22, %c0_23] : memref<9x64x128xbf16, #tpu.memory_space<vmem>>, vector<1x64x128xbf16>
    %45 = vector.shape_cast %44 : vector<1x64x128xbf16> to vector<64x128xbf16>
    %cst_24 = arith.constant dense<0.000000e+00> : vector<512x128xf32>
    %46 = tpu.matmul %43, %45, %cst_24 {dimension_numbers = #tpu.dot_dimension_numbers<[1], [0], [0], [1], [0, 0, 1, 1], [], []>} : vector<512x64xbf16>, vector<64x128xbf16>, vector<512x128xf32> -> vector<512x128xf32>
    %47 = arith.addf %42, %46 : vector<512x128xf32>
    %48 = vector.extract_strided_slice %6 {offsets = [66, 0], sizes = [512, 64], strides = [1, 1]} : vector<592x64xbf16> to vector<512x64xbf16>
    %c8 = arith.constant 8 : index
    %c0_25 = arith.constant 0 : index
    %c0_26 = arith.constant 0 : index
    %49 = vector.load %arg4[%c8, %c0_25, %c0_26] : memref<9x64x128xbf16, #tpu.memory_space<vmem>>, vector<1x64x128xbf16>
    %50 = vector.shape_cast %49 : vector<1x64x128xbf16> to vector<64x128xbf16>
    %cst_27 = arith.constant dense<0.000000e+00> : vector<512x128xf32>
    %51 = tpu.matmul %48, %50, %cst_27 {dimension_numbers = #tpu.dot_dimension_numbers<[1], [0], [0], [1], [0, 0, 1, 1], [], []>} : vector<512x64xbf16>, vector<64x128xbf16>, vector<512x128xf32> -> vector<512x128xf32>
    %52 = arith.addf %47, %51 : vector<512x128xf32>
    %c0_28 = arith.constant 0 : index
    %c0_29 = arith.constant 0 : index
    %53 = vector.load %arg5[%c0_28, %c0_29] : memref<1x128xf32, #tpu.memory_space<vmem>>, vector<1x128xf32>
    %54 = vector.broadcast %53 : vector<1x128xf32> to vector<512x128xf32>
    %55 = arith.mulf %52, %54 : vector<512x128xf32>
    %c0_30 = arith.constant 0 : index
    %c0_31 = arith.constant 0 : index
    %56 = vector.load %arg6[%c0_30, %c0_31] : memref<1x128xf32, #tpu.memory_space<vmem>>, vector<1x128xf32>
    %57 = vector.broadcast %56 : vector<1x128xf32> to vector<512x128xf32>
    %58 = arith.addf %55, %57 : vector<512x128xf32>
    %cst_32 = arith.constant 0.000000e+00 : f32
    %59 = vector.broadcast %cst_32 : f32 to vector<512x128xf32>
    %60 = arith.maximumf %58, %59 : vector<512x128xf32>
    %61 = arith.truncf %60 : vector<512x128xf32> to vector<512x128xbf16>
    %62 = vector.shape_cast %61 : vector<512x128xbf16> to vector<16x32x128xbf16>
    %63 = vector.extract_strided_slice %62 {offsets = [0, 0, 0], sizes = [16, 16, 128], strides = [1, 1, 1]} : vector<16x32x128xbf16> to vector<16x16x128xbf16>
    %64 = vector.shape_cast %63 : vector<16x16x128xbf16> to vector<1x16x16x128xbf16>
    %c0_33 = arith.constant 0 : index
    %c0_34 = arith.constant 0 : index
    %c0_35 = arith.constant 0 : index
    %c0_36 = arith.constant 0 : index
    %65 = vector.load %arg7[%c0_33, %c0_34, %c0_35, %c0_36] : memref<1x16x16x128xbf16, #tpu.memory_space<vmem>>, vector<1x16x16x128xbf16>
    tpu.vector_store %arg7[%c0_33, %c0_34, %c0_35, %c0_36], %64 {strides = array<i32>} : memref<1x16x16x128xbf16, #tpu.memory_space<vmem>>, vector<1x16x16x128xbf16>,
    return
  }
  func.func @transform_0(%arg0: i32, %arg1: i32, %arg2: i32) -> (i32, i32) {
    %c0_i32 = arith.constant 0 : i32
    %c0_i32_0 = arith.constant 0 : i32
    %c0_i32_1 = arith.constant 0 : i32
    return %c0_i32, %c0_i32_0 : i32, i32
  }
  func.func @transform_1(%arg0: i32, %arg1: i32, %arg2: i32) -> (i32, i32, i32) {
    %c0_i32 = arith.constant 0 : i32
    %c0_i32_0 = arith.constant 0 : i32
    %c0_i32_1 = arith.constant 0 : i32
    return %c0_i32, %c0_i32_0, %arg2 : i32, i32, i32
  }
  func.func @transform_2(%arg0: i32, %arg1: i32, %arg2: i32) -> (i32, i32) {
    %c0_i32 = arith.constant 0 : i32
    %c0_i32_0 = arith.constant 0 : i32
    return %c0_i32, %arg2 : i32, i32
  }
  func.func @transform_3(%arg0: i32, %arg1: i32, %arg2: i32) -> (i32, i32) {
    %c0_i32 = arith.constant 0 : i32
    %c0_i32_0 = arith.constant 0 : i32
    return %c0_i32, %arg2 : i32, i32
  }
  func.func @transform_4(%arg0: i32, %arg1: i32, %arg2: i32) -> (i32, i32, i32, i32) {
    %c0_i32 = arith.constant 0 : i32
    %c0_i32_0 = arith.constant 0 : i32
    return %arg0, %arg1, %c0_i32, %arg2 : i32, i32, i32, i32
  }
}

</mosaic_0001>

<bundles_post_ra>
// kernel: tpu_custom_call.1
= control target key start
LH: loop header
LB: loop body
LE: loop exit
PB: predicated region body
PF: predicated region fallthrough
CT: control target
= control target key end

     0   :  { %9 = vsyncpa [#allocation3], 0  ;;  %s8154_s0 = inlined_call_operand.vmem [shape: bf16[1168,64], index: 0, kind: input, shape index: {}]   ;;  %s8155_s1 = inlined_call_operand.vmem [shape: bf16[9,64,128], index: 1, kind: input, shape index: {}]   ;;  %s8156_s2 = inlined_call_operand.vmem [shape: f32[1,128], index: 2, kind: input, shape index: {}]   ;;  %s8157_s3 = inlined_call_operand.vmem [shape: f32[1,128], index: 3, kind: input, shape index: {}]   ;;  %s8158_s4 = inlined_call_operand.hbm [shape: bf16[2,16,16,128], index: 4, kind: output, shape index: {}]  }
   0x1   :  { %11 = vsyncpa [#allocation3 + $0x1], 0  ;;  %s6747_s15 = smov 0   ;;  %s6749_s16 = smov 0  }
   0x2   :  { %s6751_s17 = smov 0   ;;  %s6753_s18 = smov 0  }
   0x3   :  { %s6755_s19 = smov 0   ;;  %s6757_s20 = smov 0  }
   0x4 LB: > { %s4421_s21 = sadd.s32 4294967295, %s6717_s20   ;;  %s4422_s22 = sadd.s32 4294967294, %s6717_s20   ;;  %s6717_s20 = sphi %s6757_s20, %s17_s20   ;;  %s6713_s19 = sphi %s6755_s19, %s8317_s19   ;;  %s6709_s18 = sphi %s6753_s18, %s8316_s18   ;;  %s6705_s17 = sphi %s6751_s17, %s8315_s17   ;;  %s6701_s16 = sphi %s6749_s16, %s8314_s16   ;;  %s6697_s15 = sphi %s6747_s15, %s8313_s15  }
   0x5   : > { %s36_s23 = sadd.s32 1, %s6713_s19  ;;  %s146_s24 = sadd.s32 1, %s6705_s17 }
   0x6   : > { %p38_p0 = scmp.ge.s32.totalorder %s36_s23, 2  ;;  %p156_p1 = scmp.ne.s32.totalorder %s6705_s17, %s6701_s16 }
   0x7   : > { %p157_p2 = scmp.eq.s32.totalorder %s4421_s21, 1  ;;  %p162_p3 = scmp.ne.s32.totalorder %s6701_s16, %s6697_s15 }
   0x8   : > { %s8319_s23 = smov (%p38_p0, %s36_s23), 0  ;;  %p163_p5 = scmp.eq.s32.totalorder %s4422_s22, 1 }
   0x9   : > { %p6787_p4 = por %p157_p2, %p156_p1  ;;  %s139_s26 = ssub.s32 %s6713_s19, %s8319_s23 }
   0xa   : > { %p4427_p6 = scmp.ge.s32.totalorder %s6717_s20, 1  ;;  %p144_p7 = scmp.eq.s32.totalorder %s139_s26, 0 }
   0xb   : > { %p6794_p8 = por %p163_p5, %p162_p3  ;;  %p203_p9 = scmp.lt.s32.totalorder %s6717_s20, 3 }
   0xc   : > { %s6800_s28 = scalar_select %p144_p7, %s6705_s17, %s146_s24  }
   0xd   : > { %p204_p10 = pnand %p4427_p6, %p203_p9 }
   0xf   : > { %207 = sbr.rel (%p204_p10) target bundleno = 849 (0x351), region = 36 }
  0x16   : > { %v6542_v0 = vld [vmem:[%s8155_s1 + $0x20] sm:$0xff]   ;;  %s4429_s5 = smul.u32 576, %s6709_s18  ;;  %v6544_v2 = vld [vmem:[%s8155_s1 + $0x28] sm:$0xff]   ;;  %v6546_v4 = vld [vmem:[%s8155_s1 + $0x30] sm:$0xff]   ;;  %vm792_vm0 = vcmask 523264   ;;  %vm1500_vm2 = vcmask 1046528  }
  0x17   : > { %v6543_v1 = vld [vmem:[%s8155_s1 + $0x80] sm:$0xff]   ;;  %5349 = vmatprep.subr.bf16.mxu1 %v6542_v0  ;;  %v6545_v3 = vld [vmem:[%s8155_s1 + $0x88] sm:$0xff]   ;;  %v6547_v5 = vld [vmem:[%s8155_s1 + $0x90] sm:$0xff]   ;;  %vm507_vm1 = vsmask.f32 7424  ;;  %s231_s22 = sand.u32 1, %s6701_s16  }
  0x18   : > { %s250_s10 = sshra.s32 %s4429_s5, 3  ;;  %5637 = vmatprep.subr.bf16.mxu0 %v6543_v1  ;;  %5350 = vmatpush3.bf16.msra.mxu1 %v6542_v0  ;;  %v6548_v6 = vld [vmem:[%s8155_s1 + $0x38] sm:$0xff]   ;;  %v6554_v18 = vld [vmem:[%s8155_s1] sm:$0xff]   ;;  %v6561_v50 = vld [vmem:[%s8155_s1 + $0xa8] sm:$0xff]   ;;  %s4428_s24 = sshll.u32 %s231_s22, 7 }
  0x19   : > { %s4430_s13 = sshll.u32 %s250_s10, 2  ;;  %5638 = vmatpush3.bf16.msra.mxu0 %v6543_v1  ;;  %5351 = vmatprep.subr.bf16.mxu1 %v6544_v2  ;;  %v6549_v7 = vld [vmem:[%s8155_s1 + $0x98] sm:$0xff]   ;;  %v6556_v27 = vld [vmem:[%s8155_s1 + $0xa0] sm:$0xff]   ;;  %v6565_v56 = vld [vmem:[%s8155_s1 + $0x8] sm:$0xff]   ;;  %s8010_s26 = scalar_lea.vmem [#allocation2], %s4428_s24 }
  0x1a   : > { %5639 = vmatprep.subr.bf16.mxu0 %v6545_v3  ;;  %s6827_s6 = scalar_lea.vmem %s8154_s0, %s4430_s13  ;;  %v6567_v63 = vld [vmem:[%s8155_s1 + $0xb0] sm:$0xff]   ;;  %s4929_s29 = sshll.u32 %s6709_s18, 11 }
  0x1b   : > { %v6833_v8 = vld [vmem:[%s6827_s6] sm:$0xff]   ;;  %v6836_v9 = vld [vmem:[%s6827_s6 + $0x8] sm:$0xff]   ;;  %v6843_v14 = vld [vmem:[%s6827_s6 + $0x10] sm:$0xff]   ;;  %s4315_s30 = sshll.u32 %s8010_s26, 4  ;;  %s8101_s8 = scalar_lea.hbm %s8158_s4, %s4929_s29  ;;  %s8103_s30 = int_to_ptr.vmem [resolvable:$true] %s4315_s30 }
  0x1c   : > { %5352 = vmatpush3.bf16.msra.mxu1 %v6544_v2  ;;  %v509_v10 = vshrl.u32 %v6833_v8, 16  ;;  %v511_v11 = vshll.u32 %v6833_v8, 16  ;;  %v516_v12 = vshll.u32 %v6836_v9, 16  ;;  %v520_v13 = vshrl.u32 %v6836_v9, 16  ;;  %v6846_v15 = vld [vmem:[%s6827_s6 + $0x18] sm:$0xff]   ;;  %v6852_v19 = vld [vmem:[%s6827_s6 + $0x20] sm:$0xff]  }
  0x1d   : > { %5640 = vmatpush3.bf16.msra.mxu0 %v6545_v3  ;;  %5353 = vmatprep.subr.bf16.mxu1 %v6546_v4  ;;  %v524_v20 = vshll.u32 %v6843_v14, 16  ;;  %v528_v21 = vshrl.u32 %v6843_v14, 16  ;;  %v532_v22 = vshll.u32 %v6846_v15, 16  ;;  %v536_v23 = vshrl.u32 %v6846_v15, 16  ;;  %v6864_v32 = vld [vmem:[%s6827_s6 + $0x28] sm:$0xff]   ;;  %v6868_v34 = vld [vmem:[%s6827_s6 + $0x30] sm:$0xff]  }
  0x1e   : > { %5641 = vmatprep.subr.bf16.mxu0 %v6547_v5  ;;  %v513_v16 = vrot.slane %v511_v11, 1  ;;  %v518_v17 = vrot.slane %v516_v12, 1  ;;  %v540_v26 = vshll.u32 %v6852_v19, 16  ;;  %v544_v33 = vshrl.u32 %v6852_v19, 16  ;;  %v6877_v42 = vld [vmem:[%s6827_s6 + $0x38] sm:$0xff]   ;;  %v6886_v48 = vld [vmem:[%s6827_s6 + $0x40] sm:$0xff]  }
  0x1f   : > { %v526_v28 = vrot.slane %v524_v20, 1  ;;  %v534_v29 = vrot.slane %v532_v22, 1  ;;  %v548_v39 = vshll.u32 %v6864_v32, 16  ;;  %v552_v40 = vshrl.u32 %v6864_v32, 16  ;;  %v6898_v55 = vld [vmem:[%s6827_s6 + $0x48] sm:$0xff]   ;;  %v6922_v1 = vld [vmem:[%s6827_s6 + $0x50] sm:$0xff]  }
  0x20   : > { %5354 = vmatpush3.bf16.msra.mxu1 %v6546_v4  ;;  %v514_v24 = vor.u32 %v513_v16, %v509_v10  ;;  %v522_v25 = vor.u32 %v520_v13, %v518_v17  ;;  %v542_v31 = vrot.slane %v540_v26, 1  ;;  %v556_v41 = vshll.u32 %v6868_v34, 16  ;;  %v6572_v11 = vld [vmem:[%s8155_s1 + $0xb8] sm:$0xff]   ;;  %v6959_v22 = vld [vmem:[%s8155_s1 + $0xc0] sm:$0xff]   ;;  %s8108_s9 = scalar_lea.sflag [#allocation3], %s231_s22  ;;  %s6639_s10 = scalar_lea.vmem %s8103_s30, 2048 }
  0x21   : > { %5642 = vmatpush3.bf16.msra.mxu0 %v6547_v5  ;;  %5355 = vmatprep.subr.bf16.mxu1 %v6548_v6  ;;  %v530_v35 = vor.u32 %v528_v21, %v526_v28  ;;  %v538_v36 = vor.u32 %v536_v23, %v534_v29  ;;  %v560_v45 = vshrl.u32 %v6868_v34, 16  ;;  %v550_v46 = vrot.slane %v548_v39, 1  ;;  %v6927_v5 = vld [vmem:[%s6827_s6 + $0x58] sm:$0xff]   ;;  %v6575_v21 = vld [vmem:[%s8155_s1 + $0x10] sm:$0xff]   ;;  %p6640_p11 = scmp.ne.s32.totalorder %s8103_s30, %s6639_s10  ;;  %s6719_s18 = smov [#allocation2]  }
  0x22   : > { %5643 = vmatprep.subr.bf16.mxu0 %v6549_v7  ;;  %v519_v30 = vsel %vm507_vm1, %v514_v24, %v518_v17  ;;  %v527_v37 = vsel %vm507_vm1, %v522_v25, %v526_v28  ;;  %v546_v38 = vor.u32 %v544_v33, %v542_v31  ;;  %v564_v47 = vshll.u32 %v6877_v42, 16  ;;  %v6962_v25 = vld [vmem:[%s6827_s6 + $0x68] sm:$0xff]   ;;  %v6987_v39 = vld [vmem:[%s6827_s6 + $0x78] sm:$0xff]   ;;  %s6643_s11 = sshll.u32 %s6719_s18, 4  ;;  %s6644_s11 = int_to_ptr.vmem [resolvable:$false] %s6643_s11 }
  0x23   : > { %5357 = vmatprep.mubr.msk.bf16.mxu1 %vm792_vm0, %v519_v30  ;;  %v535_v43 = vsel %vm507_vm1, %v530_v35, %v534_v29  ;;  %v543_v44 = vsel %vm507_vm1, %v538_v36, %v542_v31  ;;  %v558_v49 = vrot.slane %v556_v41, 1  ;;  %v554_v52 = vor.u32 %v552_v40, %v550_v46  ;;  %v6982_v35 = vld [vmem:[%s6827_s6 + $0x70] sm:$0xff]   ;;  %v6585_v41 = vld [vmem:[%s8155_s1 + $0x18] sm:$0xff]   ;;  %p6641_p12 = pnand %p6640_p11, %p6787_p4  ;;  %s6645_s12 = scalar_lea.vmem %s6644_s11, 4096 }
  0x24   : > { %5356 = vmatpush3.bf16.msra.mxu1 %v6548_v6  ;;  %5645 = vmatprep.mubr.msk.bf16.mxu0 %vm792_vm0, %v535_v43  ;;  %v6893_v51 = vsel %vm507_vm1, %v546_v38, %v550_v46  ;;  %v566_v54 = vrot.slane %v564_v47, 1  ;;  %v572_v57 = vshll.u32 %v6886_v48, 16  ;;  %v568_v59 = vshrl.u32 %v6877_v42, 16  ;;  %p6646_p0 = scmp.lt.s32.totalorder %s8103_s30, %s6644_s11  ;;  %p6647_p1 = scmp.lt.s32.totalorder %s6645_s12, %s6639_s10 }
  0x25   : > { %5644 = vmatpush3.bf16.msra.mxu0 %v6549_v7  ;;  %5421 = vmatprep.subr.bf16.mxu1 %v6554_v18  ;;  %v562_v53 = vor.u32 %v560_v45, %v558_v49  ;;  %v6906_v58 = vsel %vm507_vm1, %v554_v52, %v558_v49  ;;  %v576_v61 = vshrl.u32 %v6886_v48, 16  ;;  %v580_v62 = vshll.u32 %v6898_v55, 16  ;;  %p6642_p13 = pneg %p6641_p12 }
  0x26   : > { %5709 = vmatprep.subr.bf16.mxu0 %v6556_v27  ;;  %8222 = vst [vmem:[#allocation5_spill] sm:$0xff] %v6906_v58  ;;  %v574_v0 = vrot.slane %v572_v57, 1  ;;  %v570_v2 = vor.u32 %v568_v59, %v566_v54  ;;  %v588_v6 = vshll.u32 %v6922_v1, 16  ;;  %v584_v10 = vshrl.u32 %v6898_v55, 16  ;;  %p6648_p2 = por %p6647_p1, %p6646_p0 }
  0x27   : > { %5358 = vmatmul.mubr.msk.bf16.vlgmr.msra.gmra.mrb[0].mxu1 %vm792_vm0, %v527_v37  ;;  %v6912_v60 = vsel %vm507_vm1, %v562_v53, %v566_v54  ;;  %v582_v4 = vrot.slane %v580_v62, 1  ;;  %v592_v13 = vshrl.u32 %v6922_v1, 16  ;;  %v596_v16 = vshll.u32 %v6927_v5, 16  ;;  %v7026_v62 = vld [vmem:[%s8155_s1 + $0x40] sm:$0xff]  }
  0x28   : > { %5422 = vmatpush3.bf16.msra.mxu1 %v6554_v18  ;;  %5361 = vmatprep.mubr.msk.bf16.mxu1 %vm792_vm0, %v535_v43  ;;  %8223 = vst [vmem:[#allocation6_spill] sm:$0xff] %v6912_v60  ;;  %v578_v3 = vor.u32 %v576_v61, %v574_v0  ;;  %v6933_v7 = vsel %vm507_vm1, %v570_v2, %v574_v0  ;;  %v590_v17 = vrot.slane %v588_v6, 1  ;;  %v6949_v18 = vld [vmem:[%s6827_s6 + $0x60] sm:$0xff]   ;;  %v600_v28 = vshrl.u32 %v6927_v5, 16  ;;  %v7041_v6 = vld [vmem:[%s6827_s6 + $0x90] sm:$0xff]   ;;  %p6649_p3 = pnand %p6648_p2, %p6642_p13 }
  0x29   : > { %5646 = vmatmul.mubr.msk.bf16.vlgmr.msra.gmra.mrb[0].mxu0 %vm792_vm0, %v543_v44  ;;  %5423 = vmatprep.subr.bf16.mxu1 %v6565_v56  ;;  %8224 = vst [vmem:[#allocation7_spill] sm:$0xff] %v6933_v7  ;;  %v586_v20 = vor.u32 %v584_v10, %v582_v4  ;;  %v598_v24 = vrot.slane %v596_v16, 1  ;;  %v604_v26 = vshll.u32 %v6949_v18, 16  ;;  %v608_v30 = vshrl.u32 %v6949_v18, 16 }
  0x2a   : > { %5710 = vmatpush3.bf16.msra.mxu0 %v6556_v27  ;;  %5649 = vmatprep.mubr.msk.bf16.mxu0 %vm792_vm0, %v6893_v51  ;;  %v6942_v12 = vsel %vm507_vm1, %v578_v3, %v582_v4  ;;  %v594_v23 = vor.u32 %v592_v13, %v590_v17  ;;  %v612_v31 = vshll.u32 %v6962_v25, 16  ;;  %v620_v40 = vshll.u32 %v6982_v35, 16  ;;  %v7044_v13 = vld [vmem:[%s6827_s6 + $0x98] sm:$0xff]  }
  0x2b   : > { %5711 = vmatprep.subr.bf16.mxu0 %v6561_v50  ;;  %8225 = vst [vmem:[#allocation8_spill] sm:$0xff] %v6942_v12  ;;  %v6969_v27 = vsel %vm507_vm1, %v586_v20, %v590_v17  ;;  %v606_v33 = vrot.slane %v604_v26, 1  ;;  %v602_v36 = vor.u32 %v600_v28, %v598_v24  ;;  %v624_v46 = vshrl.u32 %v6982_v35, 16 }
  0x2c   : > { %5424 = vmatpush3.bf16.msra.mxu1 %v6565_v56  ;;  %8226 = vst [vmem:[#allocation9_spill] sm:$0xff] %v6969_v27  ;;  %v6975_v29 = vsel %vm507_vm1, %v594_v23, %v598_v24  ;;  %v614_v38 = vrot.slane %v612_v31, 1  ;;  %v628_v47 = vshll.u32 %v6987_v39, 16  ;;  %v622_v49 = vrot.slane %v620_v40, 1  ;;  %v7014_v56 = vld [vmem:[%s6827_s6 + $0x88] sm:$0xff]   ;;  %v7062_v24 = vld [vmem:[%s6827_s6 + $0xa0] sm:$0xff]  }
  0x2d   : > { %5425 = vmatprep.subr.bf16.mxu1 %v6575_v21  ;;  %8227 = vst [vmem:[#allocation10_spill] sm:$0xff] %v6975_v29  ;;  %v610_v37 = vor.u32 %v608_v30, %v606_v33  ;;  %v6996_v43 = vsel %vm507_vm1, %v602_v36, %v606_v33  ;;  %v632_v61 = vshrl.u32 %v6987_v39, 16  ;;  %v644_v2 = vshll.u32 %v7014_v56, 16 }
  0x2e   : > { %5712 = vmatpush3.bf16.msra.mxu0 %v6561_v50  ;;  %8228 = vst [vmem:[#allocation11_spill] sm:$0xff] %v6996_v43  ;;  %v7009_v50 = vld [vmem:[%s6827_s6 + $0x80] sm:$0xff]   ;;  %v626_v53 = vor.u32 %v624_v46, %v622_v49  ;;  %v630_v54 = vrot.slane %v628_v47, 1  ;;  %v648_v17 = vshrl.u32 %v7014_v56, 16  ;;  %v652_v20 = vshll.u32 %v7041_v6, 16 }
  0x2f   : > { %5362 = vmatmul.mubr.msk.bf16.gmra.mrb[4].mxu1 %vm792_vm0, %v543_v44  ;;  %5713 = vmatprep.subr.bf16.mxu0 %v6567_v63  ;;  %v616_v44 = vshrl.u32 %v6962_v25, 16  ;;  %v7002_v45 = vsel %vm507_vm1, %v610_v37, %v614_v38  ;;  %v636_v57 = vshll.u32 %v7009_v50, 16  ;;  %v640_v0 = vshrl.u32 %v7009_v50, 16  ;;  %v7071_v37 = vld [vmem:[%s6827_s6 + $0xa8] sm:$0xff]  }
  0x30   : > { %5365 = vmatprep.mubr.msk.bf16.mxu1 %vm792_vm0, %v6893_v51  ;;  %5426 = vmatpush3.bf16.msra.mxu1 %v6575_v21  ;;  %8229 = vst [vmem:[#allocation12_spill] sm:$0xff] %v7002_v45  ;;  %v634_v4 = vor.u32 %v632_v61, %v630_v54  ;;  %v660_v23 = vshll.u32 %v7044_v13, 16  ;;  %v654_v28 = vrot.slane %v652_v20, 1  ;;  %v8159_v30 = vrot.slane %v6843_v14, 1 }
  0x31   : > { %5650 = vmatmul.mubr.msk.bf16.gmra.mrb[4].mxu0 %vm792_vm0, %v6906_v58  ;;  %5427 = vmatprep.subr.bf16.mxu1 %v6585_v41  ;;  %v618_v52 = vor.u32 %v616_v44, %v614_v38  ;;  %v638_v3 = vrot.slane %v636_v57, 1  ;;  %v1506_v31 = vrot.slane %v6846_v15, 1  ;;  %v1508_v33 = vrot.slane %v6852_v19, 1 }
  0x32   : > { %5653 = vmatprep.mubr.msk.bf16.mxu0 %vm792_vm0, %v6912_v60  ;;  %5714 = vmatpush3.bf16.msra.mxu0 %v6567_v63  ;;  %v7031_v63 = vsel %vm507_vm1, %v626_v53, %v630_v54  ;;  %v656_v36 = vshrl.u32 %v7041_v6, 16  ;;  %v1510_v38 = vrot.slane %v6864_v32, 1  ;;  %v664_v40 = vshrl.u32 %v7044_v13, 16 }
  0x33   : > { %5715 = vmatprep.subr.bf16.mxu0 %v6572_v11  ;;  %v7020_v59 = vsel %vm507_vm1, %v618_v52, %v622_v49  ;;  %8231 = vst [vmem:[#allocation14_spill] sm:$0xff] %v7031_v63  ;;  %v642_v10 = vor.u32 %v640_v0, %v638_v3  ;;  %v7049_v16 = vsel %vm507_vm1, %v634_v4, %v638_v3  ;;  %v668_v44 = vshll.u32 %v7062_v24, 16  ;;  %v7103_v0 = vld [vmem:[%s6827_s6 + $0xb0] sm:$0xff]   ;;  %v6586_v4 = vld [vmem:[%s8155_s1 + $0xc8] sm:$0xff]  }
  0x34   : > { %5428 = vmatpush3.bf16.msra.mxu1 %v6585_v41  ;;  %8230 = vst [vmem:[#allocation13_spill] sm:$0xff] %v7020_v59  ;;  %8232 = vst [vmem:[#allocation15_spill] sm:$0xff] %v7049_v16  ;;  %v662_v41 = vrot.slane %v660_v23, 1  ;;  %v7086_v47 = vsel %vm1500_vm2, %v8159_v30, %v1506_v31  ;;  %v672_v49 = vshrl.u32 %v7062_v24, 16  ;;  %v676_v52 = vshll.u32 %v7071_v37, 16 }
  0x35   : > { %5493 = vmatprep.subr.bf16.mxu1 %v7026_v62  ;;  %v658_v53 = vor.u32 %v656_v36, %v654_v28  ;;  %v7100_v57 = vsel %vm1500_vm2, %v1506_v31, %v1508_v33  ;;  %v670_v61 = vrot.slane %v668_v44, 1  ;;  %v1512_v20 = vrot.slane %v6868_v34, 1 }
  0x36   : > { %5716 = vmatpush3.bf16.msra.mxu0 %v6572_v11  ;;  %v646_v11 = vrot.slane %v644_v2, 1  ;;  %v7108_v2 = vsel %vm1500_vm2, %v1508_v33, %v1510_v38  ;;  %v666_v3 = vor.u32 %v664_v40, %v662_v41  ;;  %v684_v23 = vshll.u32 %v7103_v0, 16  ;;  %v6595_v33 = vld [vmem:[%s8155_s1 + $0xd0] sm:$0xff]  }
  0x37   : > { %5366 = vmatmul.mubr.msk.bf16.gmra.mrb[8].mxu1 %vm792_vm0, %v6906_v58  ;;  %5781 = vmatprep.subr.bf16.mxu0 %v6959_v22  ;;  %v7095_v54 = vsel %vm507_vm1, %v658_v53, %v662_v41  ;;  %v680_v31 = vshrl.u32 %v7071_v37, 16  ;;  %v688_v36 = vshrl.u32 %v7103_v0, 16  ;;  %v7139_v41 = vsel %vm1500_vm2, %v1510_v38, %v1512_v20  ;;  %v7153_v38 = vld [vmem:[%s6827_s6 + $0xc8] sm:$0xff]  }
  0x38   : > { %5369 = vmatprep.mubr.msk.bf16.mxu1 %vm792_vm0, %v6912_v60  ;;  %v7056_v21 = vsel %vm507_vm1, %v642_v10, %v646_v11  ;;  %v650_v26 = vor.u32 %v648_v17, %v646_v11  ;;  %8235 = vst [vmem:[#allocation18_spill] sm:$0xff] %v7095_v54  ;;  %v674_v10 = vor.u32 %v672_v49, %v670_v61  ;;  %v678_v11 = vrot.slane %v676_v52, 1  ;;  %v7114_v17 = vld [vmem:[%s6827_s6 + $0xb8] sm:$0xff]   ;;  %v7142_v49 = vld [vmem:[%s6827_s6 + $0xc0] sm:$0xff]  }
  0x39   : > { %5654 = vmatmul.mubr.msk.bf16.gmra.mrb[8].mxu0 %vm792_vm0, %v6933_v7  ;;  %8233 = vst [vmem:[#allocation16_spill] sm:$0xff] %v7056_v21  ;;  %v692_v40 = vshll.u32 %v7114_v17, 16  ;;  %v686_v44 = vrot.slane %v684_v23, 1  ;;  %v1518_v23 = vrot.slane %v6898_v55, 1  ;;  %v704_v30 = vshrl.u32 %v7142_v49, 16 }
  0x3a   : > { %5657 = vmatprep.mubr.msk.bf16.mxu0 %vm792_vm0, %v6942_v12  ;;  %v7079_v46 = vsel %vm507_vm1, %v650_v26, %v654_v28  ;;  %v7124_v26 = vsel %vm507_vm1, %v666_v3, %v670_v61  ;;  %v1514_v28 = vrot.slane %v6877_v42, 1  ;;  %v682_v53 = vor.u32 %v680_v31, %v678_v11  ;;  %v6597_v61 = vld [vmem:[%s8155_s1 + $0xd8] sm:$0xff]  }
  0x3b   : > { %8234 = vst [vmem:[#allocation17_spill] sm:$0xff] %v7079_v46  ;;  %8236 = vst [vmem:[#allocation19_spill] sm:$0xff] %v7124_v26  ;;  %v690_v3 = vor.u32 %v688_v36, %v686_v44  ;;  %v696_v31 = vshrl.u32 %v7114_v17, 16  ;;  %v7169_v36 = vld [vmem:[%s8155_s1 + $0xe0] sm:$0xff]  }
  0x3c   : > { %v7147_v52 = vsel %vm1500_vm2, %v1512_v20, %v1514_v28  ;;  %v7162_v20 = vsel %vm507_vm1, %v682_v53, %v686_v44 }
  0x3d   : > { %8238 = vst [vmem:[#allocation21_spill] sm:$0xff] %v7162_v20 }
  0x3f   : > { %5370 = vmatmul.mubr.msk.bf16.gmra.mrb[12].mxu1 %vm792_vm0, %v6933_v7 }
  0x40   : > { %5373 = vmatprep.mubr.msk.bf16.mxu1 %vm792_vm0, %v6942_v12 }
  0x41   : > { %5658 = vmatmul.mubr.msk.bf16.gmra.mrb[12].mxu0 %vm792_vm0, %v6969_v27 }
  0x42   : > { %5661 = vmatprep.mubr.msk.bf16.mxu0 %vm792_vm0, %v6975_v29 }
  0x47   : > { %5374 = vmatmul.mubr.msk.bf16.gmra.mrb[16].mxu1 %vm792_vm0, %v6969_v27  ;;  %v7255_v27 = vld [vmem:[%s6827_s6 + $0xf8] sm:$0xff]  }
  0x48   : > { %5377 = vmatprep.mubr.msk.bf16.mxu1 %vm792_vm0, %v6975_v29 }
  0x49   : > { %5662 = vmatmul.mubr.msk.bf16.gmra.mrb[16].mxu0 %vm792_vm0, %v6996_v43 }
  0x4a   : > { %5665 = vmatprep.mubr.msk.bf16.mxu0 %vm792_vm0, %v7002_v45 }
  0x4f   : > { %5378 = vmatmul.mubr.msk.bf16.gmra.mrb[20].mxu1 %vm792_vm0, %v6996_v43 }
  0x50   : > { %5381 = vmatprep.mubr.msk.bf16.mxu1 %vm792_vm0, %v7002_v45 }
  0x51   : > { %5666 = vmatmul.mubr.msk.bf16.gmra.mrb[20].mxu0 %vm792_vm0, %v7020_v59 }
  0x52   : > { %5669 = vmatprep.mubr.msk.bf16.mxu0 %vm792_vm0, %v7031_v63 }
  0x57   : > { %5382 = vmatmul.mubr.msk.bf16.gmra.mrb[24].mxu1 %vm792_vm0, %v7020_v59  ;;  %v7223_v59 = vld [vmem:[%s6827_s6 + $0xe8] sm:$0xff]  }
  0x58   : > { %5385 = vmatprep.mubr.msk.bf16.mxu1 %vm792_vm0, %v7031_v63 }
  0x59   : > { %5670 = vmatmul.mubr.msk.bf16.gmra.mrb[24].mxu0 %vm792_vm0, %v7049_v16 }
  0x5a   : > { %5673 = vmatprep.mubr.msk.bf16.mxu0 %vm792_vm0, %v7056_v21 }
  0x5f   : > { %5386 = vmatmul.mubr.msk.bf16.gmra.mrb[28].mxu1 %vm792_vm0, %v7049_v16 }
  0x60   : > { %5389 = vmatprep.mubr.msk.bf16.mxu1 %vm792_vm0, %v7056_v21 }
  0x61   : > { %5674 = vmatmul.mubr.msk.bf16.gmra.mrb[28].mxu0 %vm792_vm0, %v7079_v46 }
  0x62   : > { %5717 = vmatprep.mubr.msk.bf16.mxu0 %vm792_vm0, %v7086_v47 }
  0x67   : > { %5390 = vmatmul.mubr.msk.bf16.gmra.mrb[32].mxu1 %vm792_vm0, %v7079_v46 }
  0x68   : > { %5393 = vmatprep.mubr.msk.bf16.mxu1 %vm792_vm0, %v7095_v54 }
  0x69   : > { %5718 = vmatmul.mubr.msk.bf16.vlgmr.msra.gmra.mrb[0].mxu0 %vm792_vm0, %v7100_v57 }
  0x6a   : > { %5782 = vmatpush3.bf16.msra.mxu0 %v6959_v22  ;;  %5721 = vmatprep.mubr.msk.bf16.mxu0 %vm792_vm0, %v7108_v2  ;;  %v7132_v22 = vsel %vm507_vm1, %v674_v10, %v678_v11  ;;  %v694_v10 = vrot.slane %v692_v40, 1  ;;  %v700_v11 = vshll.u32 %v7142_v49, 16 }
  0x6b   : > { %5783 = vmatprep.subr.bf16.mxu0 %v6586_v4  ;;  %8237 = vst [vmem:[#allocation20_spill] sm:$0xff] %v7132_v22 }
  0x6c   : > { %v7172_v40 = vsel %vm507_vm1, %v690_v3, %v694_v10  ;;  %v702_v53 = vrot.slane %v700_v11, 1 }
  0x6d   : > { %8239 = vst [vmem:[#allocation22_spill] sm:$0xff] %v7172_v40 }
  0x6e   : > { %5784 = vmatpush3.bf16.msra.mxu0 %v6586_v4  ;;  %v1516_v4 = vrot.slane %v6886_v48, 1  ;;  %v706_v54 = vor.u32 %v704_v30, %v702_v53  ;;  %v1522_v30 = vrot.slane %v6927_v5, 1 }
  0x6f   : > { %5394 = vmatmul.mubr.msk.bf16.gmra.mrb[36].mxu1 %vm792_vm0, %v7124_v26  ;;  %5785 = vmatprep.subr.bf16.mxu0 %v6595_v33  ;;  %v698_v26 = vor.u32 %v696_v31, %v694_v10 }
  0x70   : > { %5397 = vmatprep.mubr.msk.bf16.mxu1 %vm792_vm0, %v7132_v22  ;;  %v7179_v44 = vsel %vm1500_vm2, %v1514_v28, %v1516_v4  ;;  %v7182_v22 = vld [vmem:[%s6827_s6 + $0xd0] sm:$0xff]   ;;  %v7187_v3 = vsel %vm1500_vm2, %v1516_v4, %v1518_v23  ;;  %v1520_v28 = vrot.slane %v6922_v1, 1  ;;  %v712_v4 = vshrl.u32 %v7153_v38, 16 }
  0x71   : > { %5722 = vmatmul.mubr.msk.bf16.gmra.mrb[4].mxu0 %vm792_vm0, %v7139_v41  ;;  %v7200_v10 = vsel %vm507_vm1, %v698_v26, %v702_v53  ;;  %v720_v31 = vshrl.u32 %v7182_v22, 16  ;;  %v7215_v26 = vld [vmem:[%s6827_s6 + $0xe0] sm:$0xff]  }
  0x72   : > { %5725 = vmatprep.mubr.msk.bf16.mxu0 %vm792_vm0, %v7147_v52  ;;  %5786 = vmatpush3.bf16.msra.mxu0 %v6595_v33  ;;  %v708_v33 = vshll.u32 %v7153_v38, 16  ;;  %8240 = vst [vmem:[#allocation23_spill] sm:$0xff] %v7200_v10  ;;  %v7220_v53 = vsel %vm1500_vm2, %v1520_v28, %v1522_v30 }
  0x73   : > { %5787 = vmatprep.subr.bf16.mxu0 %v6597_v61 }
  0x74   : > { %v710_v46 = vrot.slane %v708_v33, 1 }
  0x76   : > { %5788 = vmatpush3.bf16.msra.mxu0 %v6597_v61  ;;  %v716_v61 = vshll.u32 %v7182_v22, 16  ;;  %v7205_v11 = vsel %vm507_vm1, %v706_v54, %v710_v46  ;;  %v714_v54 = vor.u32 %v712_v4, %v710_v46  ;;  %v1526_v46 = vrot.slane %v6962_v25, 1 }
  0x77   : > { %5398 = vmatmul.mubr.msk.bf16.gmra.mrb[40].mxu1 %vm792_vm0, %v7162_v20  ;;  %5853 = vmatprep.subr.bf16.mxu0 %v7169_v36  ;;  %v7191_v20 = vld [vmem:[%s6827_s6 + $0xd8] sm:$0xff]   ;;  %8241 = vst [vmem:[#allocation24_spill] sm:$0xff] %v7205_v11 }
  0x78   : > { %5401 = vmatprep.mubr.msk.bf16.mxu1 %vm792_vm0, %v7172_v40  ;;  %v724_v33 = vshll.u32 %v7191_v20, 16  ;;  %v7212_v40 = vsel %vm1500_vm2, %v1518_v23, %v1520_v28  ;;  %v718_v21 = vrot.slane %v716_v61, 1  ;;  %v1524_v23 = vrot.slane %v6949_v18, 1 }
  0x79   : > { %5726 = vmatmul.mubr.msk.bf16.gmra.mrb[8].mxu0 %vm792_vm0, %v7179_v44  ;;  %v732_v61 = vshll.u32 %v7215_v26, 16  ;;  %v728_v4 = vshrl.u32 %v7191_v20, 16 }
  0x7a   : > { %5729 = vmatprep.mubr.msk.bf16.mxu0 %vm792_vm0, %v7187_v3  ;;  %v722_v16 = vor.u32 %v720_v31, %v718_v21  ;;  %v726_v63 = vrot.slane %v724_v33, 1  ;;  %v7232_v28 = vsel %vm507_vm1, %v714_v54, %v718_v21  ;;  %v736_v33 = vshrl.u32 %v7215_v26, 16  ;;  %v7247_v21 = vld [vmem:[%s6827_s6 + $0xf0] sm:$0xff]  }
  0x7b   : > { %8242 = vst [vmem:[#allocation25_spill] sm:$0xff] %v7232_v28  ;;  %v734_v45 = vrot.slane %v732_v61, 1  ;;  %v748_v61 = vshll.u32 %v7247_v21, 16 }
  0x7c   : > { %v7237_v31 = vsel %vm507_vm1, %v722_v16, %v726_v63  ;;  %v7252_v16 = vsel %vm1500_vm2, %v1524_v23, %v1526_v46  ;;  %v730_v54 = vor.u32 %v728_v4, %v726_v63  ;;  %v744_v63 = vshrl.u32 %v7223_v59, 16 }
  0x7d   : > { %8243 = vst [vmem:[#allocation26_spill] sm:$0xff] %v7237_v31  ;;  %v738_v43 = vor.u32 %v736_v33, %v734_v45  ;;  %v752_v4 = vshrl.u32 %v7247_v21, 16  ;;  %v756_v33 = vshll.u32 %v7255_v27, 16 }
  0x7f   : > { %5402 = vmatmul.mubr.msk.bf16.gmra.mrb[44].mxu1 %vm792_vm0, %v7200_v10  ;;  %v7244_v10 = vsel %vm1500_vm2, %v1522_v30, %v1524_v23  ;;  %v1528_v30 = vrot.slane %v6982_v35, 1  ;;  %v1530_v23 = vrot.slane %v6987_v39, 1  ;;  %v758_v58 = vrot.slane %v756_v33, 1 }
  0x80   : > { %5405 = vmatprep.mubr.msk.bf16.mxu1 %vm792_vm0, %v7205_v11  ;;  %v740_v11 = vshll.u32 %v7223_v59, 16 }
  0x81   : > { %5730 = vmatmul.mubr.msk.bf16.gmra.mrb[12].mxu0 %vm792_vm0, %v7212_v40  ;;  %v7279_v12 = vsel %vm1500_vm2, %v1526_v46, %v1528_v30  ;;  %v1532_v46 = vrot.slane %v7009_v50, 1 }
  0x82   : > { %5733 = vmatprep.mubr.msk.bf16.mxu0 %vm792_vm0, %v7220_v53  ;;  %v742_v29 = vrot.slane %v740_v11, 1 }
  0x83   : > { %v7307_v33 = vsel %vm1500_vm2, %v1530_v23, %v1532_v46 }
  0x84   : > { %v7269_v11 = vsel %vm507_vm1, %v738_v43, %v742_v29  ;;  %v746_v43 = vor.u32 %v744_v63, %v742_v29  ;;  %v760_v29 = vshrl.u32 %v7255_v27, 16 }
  0x85   : > { %8245 = vst [vmem:[#allocation28_spill] sm:$0xff] %v7269_v11 }
  0x87   : > { %5406 = vmatmul.mubr.msk.bf16.gmra.mrb[48].mxu1 %vm792_vm0, %v7232_v28  ;;  %v7274_v28 = vld [vmem:[%s6827_s6 + $0x100] sm:$0xf] }
  0x88   : > { %5409 = vmatprep.mubr.msk.bf16.mxu1 %vm792_vm0, %v7237_v31  ;;  %v7264_v31 = vsel %vm507_vm1, %v730_v54, %v734_v45  ;;  %v750_v45 = vrot.slane %v748_v61, 1  ;;  %v7284_v54 = vsel %vm1500_vm2, %v1528_v30, %v1530_v23  ;;  %v7288_v7 = vcombine.low %v7274_v28, %v7274_v28 }
  0x89   : > { %5734 = vmatmul.mubr.msk.bf16.gmra.mrb[16].mxu0 %vm792_vm0, %v7244_v10  ;;  %8244 = vst [vmem:[#allocation27_spill] sm:$0xff] %v7264_v31  ;;  %v1534_v30 = vrot.slane %v7014_v56, 1 }
  0x8a   : > { %5737 = vmatprep.mubr.msk.bf16.mxu0 %vm792_vm0, %v7252_v16  ;;  %8246 = vst [vmem:[#allocation29_spill] sm:$0xff] %v7288_v7  ;;  %v754_v60 = vor.u32 %v752_v4, %v750_v45  ;;  %v7296_v61 = vsel %vm507_vm1, %v746_v43, %v750_v45  ;;  %v764_v63 = vshll.u32 %v7288_v7, 16  ;;  %v7314_v43 = vor.u32 %v760_v29, %v758_v58  ;;  %v319_v7 = vld [vmem:[%s6827_s6 + $0x104] sm:$0xf] }
  0x8b   : > { %8247 = vst [vmem:[#allocation30_spill] sm:$0xff] %v7296_v61  ;;  %v7312_v45 = vsel %vm1500_vm2, %v1532_v46, %v1534_v30  ;;  %v1542_v29 = vrot.slane %v7071_v37, 1 }
  0x8c   : > { %v7302_v4 = vsel %vm507_vm1, %v754_v60, %v758_v58  ;;  %8249 = vst [vmem:[#allocation32_spill] sm:$0xff] %v7314_v43  ;;  %v1536_v60 = vrot.slane %v7041_v6, 1 }
  0x8d   : > { %8248 = vst [vmem:[#allocation31_spill] sm:$0xff] %v7302_v4 }
  0x8e   : > { %v7326_v46 = vsel %vm1500_vm2, %v1534_v30, %v1536_v60  ;;  %v6596_v30 = vld [vmem:[%s8155_s1 + $0x48] sm:$0xff]  }
  0x8f   : > { %5410 = vmatmul.mubr.msk.bf16.gmra.mrb[52].mxu1 %vm792_vm0, %v7264_v31  ;;  %v1560_v31 = vrot.slane %v7247_v21, 1 }
  0x90   : > { %5413 = vmatprep.mubr.msk.bf16.mxu1 %vm792_vm0, %v7269_v11  ;;  %v766_v11 = vrot.slane %v764_v63, 1 }
  0x91   : > { %5738 = vmatmul.mubr.msk.bf16.gmra.mrb[20].mxu0 %vm792_vm0, %v7279_v12 }
  0x92   : > { %5741 = vmatprep.mubr.msk.bf16.mxu0 %vm792_vm0, %v7284_v54  ;;  %v767_v23 = vsel %vm507_vm1, %v7314_v43, %v766_v11  ;;  %v1540_v11 = vrot.slane %v7062_v24, 1  ;;  %v1556_v43 = vrot.slane %v7215_v26, 1 }
  0x94   : > { %v7351_v63 = vsel %vm1500_vm2, %v1540_v11, %v1542_v29 }
  0x97   : > { %5414 = vmatmul.mubr.msk.bf16.gmra.mrb[56].mxu1 %vm792_vm0, %v7296_v61  ;;  %v1538_v61 = vrot.slane %v7044_v13, 1 }
  0x98   : > { %5417 = vmatprep.mubr.msk.bf16.mxu1 %vm792_vm0, %v7302_v4  ;;  %v1558_v4 = vrot.slane %v7223_v59, 1 }
  0x99   : > { %5742 = vmatmul.mubr.msk.bf16.gmra.mrb[24].mxu0 %vm792_vm0, %v7307_v33  ;;  %v7331_v58 = vsel %vm1500_vm2, %v1536_v60, %v1538_v61  ;;  %v6600_v60 = vld [vmem:[%s8155_s1 + $0x50] sm:$0xff]  }
  0x9a   : > { %5745 = vmatprep.mubr.msk.bf16.mxu0 %vm792_vm0, %v7312_v45 }
  0x9f   : > { %5418 = vmatmul.mubr.msk.bf16.gmra.mrb[60].mxu1 %vm792_vm0, %v767_v23 }
  0xa0   : > { %5429 = vmatprep.mubr.msk.bf16.mxu1 %vm792_vm0, %v6833_v8  ;;  %v7345_v8 = vsel %vm1500_vm2, %v1538_v61, %v1540_v11  ;;  %v6602_v61 = vld [vmem:[%s8155_s1 + $0x58] sm:$0xff]  }
  0xa1   : > { %5746 = vmatmul.mubr.msk.bf16.gmra.mrb[28].mxu0 %vm792_vm0, %v7326_v46 }
  0xa2   : > { %5749 = vmatprep.mubr.msk.bf16.mxu0 %vm792_vm0, %v7331_v58 }
  0xa7   : > { %5430 = vmatmul.mubr.msk.bf16.vlgmr.msra.gmra.mrb[0].mxu1 %vm792_vm0, %v6836_v9  ;;  %v1544_v9 = vrot.slane %v7103_v0, 1 }
  0xa8   : > { %5494 = vmatpush3.bf16.msra.mxu1 %v7026_v62  ;;  %5433 = vmatprep.mubr.msk.bf16.mxu1 %vm792_vm0, %v6843_v14  ;;  %v1546_v62 = vrot.slane %v7114_v17, 1 }
  0xa9   : > { %5495 = vmatprep.subr.bf16.mxu1 %v6596_v30  ;;  %5750 = vmatmul.mubr.msk.bf16.gmra.mrb[32].mxu0 %vm792_vm0, %v7345_v8  ;;  %v7368_v23 = vsel %vm1500_vm2, %v1542_v29, %v1544_v9 }
  0xaa   : > { %5753 = vmatprep.mubr.msk.bf16.mxu0 %vm792_vm0, %v7351_v63  ;;  %v7373_v11 = vsel %vm1500_vm2, %v1544_v9, %v1546_v62  ;;  %v1552_v9 = vrot.slane %v7182_v22, 1 }
  0xac   : > { %5496 = vmatpush3.bf16.msra.mxu1 %v6596_v30  ;;  %v7378_v30 = vld [vmem:[%s8155_s1 + $0x60] sm:$0xff]  }
  0xad   : > { %5497 = vmatprep.subr.bf16.mxu1 %v6600_v60 }
  0xaf   : > { %5434 = vmatmul.mubr.msk.bf16.gmra.mrb[4].mxu1 %vm792_vm0, %v6846_v15  ;;  %v1548_v15 = vrot.slane %v7142_v49, 1 }
  0xb0   : > { %5437 = vmatprep.mubr.msk.bf16.mxu1 %vm792_vm0, %v6852_v19  ;;  %5498 = vmatpush3.bf16.msra.mxu1 %v6600_v60  ;;  %v1550_v19 = vrot.slane %v7153_v38, 1 }
  0xb1   : > { %5499 = vmatprep.subr.bf16.mxu1 %v6602_v61  ;;  %5754 = vmatmul.mubr.msk.bf16.gmra.mrb[36].mxu0 %vm792_vm0, %v7368_v23  ;;  %v7390_v29 = vsel %vm1500_vm2, %v1546_v62, %v1548_v15 }
  0xb2   : > { %5757 = vmatprep.mubr.msk.bf16.mxu0 %vm792_vm0, %v7373_v11  ;;  %v7395_v60 = vsel %vm1500_vm2, %v1548_v15, %v1550_v19  ;;  %v7406_v62 = vsel %vm1500_vm2, %v1550_v19, %v1552_v9 }
  0xb3   : > { %8250 = vst [vmem:[#allocation33_spill] sm:$0xff] %v7406_v62 }
  0xb4   : > { %5500 = vmatpush3.bf16.msra.mxu1 %v6602_v61  ;;  %v1554_v61 = vrot.slane %v7191_v20, 1 }
  0xb5   : > { %5565 = vmatprep.subr.bf16.mxu1 %v7378_v30 }
  0xb6   : > { %v7411_v15 = vsel %vm1500_vm2, %v1552_v9, %v1554_v61  ;;  %v7422_v19 = vsel %vm1500_vm2, %v1554_v61, %v1556_v43  ;;  %v7427_v9 = vsel %vm1500_vm2, %v1556_v43, %v1558_v4  ;;  %v7439_v61 = vcombine.low %v7274_v28, %v319_v7 }
  0xb7   : > { %5438 = vmatmul.mubr.msk.bf16.gmra.mrb[8].mxu1 %vm792_vm0, %v6864_v32  ;;  %8251 = vst [vmem:[#allocation34_spill] sm:$0xff] %v7411_v15  ;;  %8252 = vst [vmem:[#allocation35_spill] sm:$0xff] %v7422_v19  ;;  %v7444_v43 = vsel %vm1500_vm2, %v1558_v4, %v1560_v31  ;;  %v7464_v4 = vld [vmem:[%s6827_s6 + $0x110] sm:$0xf] }
  0xb8   : > { %5441 = vmatprep.mubr.msk.bf16.mxu1 %vm792_vm0, %v6868_v34  ;;  %8253 = vst [vmem:[#allocation36_spill] sm:$0xff] %v7427_v9  ;;  %8255 = vst [vmem:[#allocation38_spill] sm:$0xff] %v7444_v43  ;;  %v2673_v7 = vrot.slane %v7439_v61, 1 }
  0xb9   : > { %5758 = vmatmul.mubr.msk.bf16.gmra.mrb[40].mxu0 %vm792_vm0, %v7390_v29 }
  0xba   : > { %5761 = vmatprep.mubr.msk.bf16.mxu0 %vm792_vm0, %v7395_v60 }
  0xbf   : > { %5442 = vmatmul.mubr.msk.bf16.gmra.mrb[12].mxu1 %vm792_vm0, %v6877_v42 }
  0xc0   : > { %5445 = vmatprep.mubr.msk.bf16.mxu1 %vm792_vm0, %v6886_v48 }
  0xc1   : > { %5762 = vmatmul.mubr.msk.bf16.gmra.mrb[44].mxu0 %vm792_vm0, %v7406_v62 }
  0xc2   : > { %5765 = vmatprep.mubr.msk.bf16.mxu0 %vm792_vm0, %v7411_v15  ;;  %v7436_v15 = vrot.slane %v7255_v27, 1 }
  0xc4   : > { %8254 = vst [vmem:[#allocation37_spill] sm:$0xff] %v7436_v15 }
  0xc7   : > { %5446 = vmatmul.mubr.msk.bf16.gmra.mrb[16].mxu1 %vm792_vm0, %v6898_v55 }
  0xc8   : > { %5449 = vmatprep.mubr.msk.bf16.mxu1 %vm792_vm0, %v6922_v1 }
  0xc9   : > { %5766 = vmatmul.mubr.msk.bf16.gmra.mrb[48].mxu0 %vm792_vm0, %v7422_v19  ;;  %v7453_v19 = vld [vmem:[%s6827_s6 + $0x108] sm:$0xff]  }
  0xca   : > { %5769 = vmatprep.mubr.msk.bf16.mxu0 %vm792_vm0, %v7427_v9  ;;  %v7450_v9 = vsel %vm1500_vm2, %v1560_v31, %v7436_v15  ;;  %v7461_v28 = vrot.slane %v7453_v19, 1  ;;  %v7470_v31 = vsel %vm1500_vm2, %v7436_v15, %v2673_v7 }
  0xcb   : > { %8256 = vst [vmem:[#allocation39_spill] sm:$0xff] %v7450_v9  ;;  %8258 = vst [vmem:[#allocation41_spill] sm:$0xff] %v7470_v31 }
  0xcc   : > { %8257 = vst [vmem:[#allocation40_spill] sm:$0xff] %v7461_v28 }
  0xcf   : > { %5450 = vmatmul.mubr.msk.bf16.gmra.mrb[20].mxu1 %vm792_vm0, %v6927_v5 }
  0xd0   : > { %5453 = vmatprep.mubr.msk.bf16.mxu1 %vm792_vm0, %v6949_v18 }
  0xd1   : > { %5770 = vmatmul.mubr.msk.bf16.gmra.mrb[52].mxu0 %vm792_vm0, %v7444_v43  ;;  %v7474_v43 = vcombine.low %v7464_v4, %v7464_v4 }
  0xd2   : > { %5773 = vmatprep.mubr.msk.bf16.mxu0 %vm792_vm0, %v7450_v9  ;;  %v7480_v9 = vsel %vm1500_vm2, %v2673_v7, %v7461_v28  ;;  %v7495_v7 = vld [vmem:[%s6827_s6 + $0x20] sm:$0xff]  }
  0xd3   : > { %8259 = vst [vmem:[#allocation42_spill] sm:$0xff] %v7474_v43  ;;  %8260 = vst [vmem:[#allocation43_spill] sm:$0xff] %v7480_v9  ;;  %v2677_v15 = vrot.slane %v7474_v43, 1  ;;  %v8295_v43 = vld [vmem:[#allocation30_spill] sm:$0xff] }
  0xd5   : > { %v2678_v62 = vsel %vm1500_vm2, %v7461_v28, %v2677_v15  ;;  %v6603_v15 = vld [vmem:[%s8155_s1 + $0xe8] sm:$0xff]   ;;  %v6633_v28 = vld [vmem:[%s6827_s6 + $0x60] sm:$0xff]  }
  0xd7   : > { %5454 = vmatmul.mubr.msk.bf16.gmra.mrb[24].mxu1 %vm792_vm0, %v6962_v25 }
  0xd8   : > { %5457 = vmatprep.mubr.msk.bf16.mxu1 %vm792_vm0, %v6982_v35 }
  0xd9   : > { %5774 = vmatmul.mubr.msk.bf16.gmra.mrb[56].mxu0 %vm792_vm0, %v7470_v31  ;;  %v8296_v31 = vld [vmem:[#allocation31_spill] sm:$0xff] }
  0xda   : > { %5777 = vmatprep.mubr.msk.bf16.mxu0 %vm792_vm0, %v7480_v9 }
  0xdf   : > { %5458 = vmatmul.mubr.msk.bf16.gmra.mrb[28].mxu1 %vm792_vm0, %v6987_v39 }
  0xe0   : > { %5461 = vmatprep.mubr.msk.bf16.mxu1 %vm792_vm0, %v7009_v50 }
  0xe1   : > { %5778 = vmatmul.mubr.msk.bf16.gmra.mrb[60].mxu0 %vm792_vm0, %v2678_v62  ;;  %v6605_v62 = vld [vmem:[%s8155_s1 + $0xf0] sm:$0xff]  }
  0xe2   : > { %5789 = vmatprep.mubr.msk.bf16.mxu0 %vm792_vm0, %v7495_v7 }
  0xe7   : > { %5462 = vmatmul.mubr.msk.bf16.gmra.mrb[32].mxu1 %vm792_vm0, %v7014_v56 }
  0xe8   : > { %5465 = vmatprep.mubr.msk.bf16.mxu1 %vm792_vm0, %v7041_v6 }
  0xe9   : > { %5790 = vmatmul.mubr.msk.bf16.vlgmr.msra.gmra.mrb[0].mxu0 %vm792_vm0, %v6864_v32  ;;  %v6607_v32 = vld [vmem:[%s8155_s1 + $0xf8] sm:$0xff]  }
  0xea   : > { %5854 = vmatpush3.bf16.msra.mxu0 %v7169_v36  ;;  %5793 = vmatprep.mubr.msk.bf16.mxu0 %vm792_vm0, %v6868_v34  ;;  %v7528_v34 = vld [vmem:[%s8155_s1 + $0x100] sm:$0xff]   ;;  %v6613_v36 = vld [vmem:[%s8155_s1 + $0x108] sm:$0xff]  }
  0xeb   : > { %5855 = vmatprep.subr.bf16.mxu0 %v6603_v15 }
  0xee   : > { %5856 = vmatpush3.bf16.msra.mxu0 %v6603_v15  ;;  %v6615_v15 = vld [vmem:[%s8155_s1 + $0x118] sm:$0xff]  }
  0xef   : > { %5466 = vmatmul.mubr.msk.bf16.gmra.mrb[36].mxu1 %vm792_vm0, %v7044_v13  ;;  %5857 = vmatprep.subr.bf16.mxu0 %v6605_v62 }
  0xf0   : > { %5469 = vmatprep.mubr.msk.bf16.mxu1 %vm792_vm0, %v7062_v24 }
  0xf1   : > { %5794 = vmatmul.mubr.msk.bf16.gmra.mrb[4].mxu0 %vm792_vm0, %v6877_v42  ;;  %v6618_v42 = vld [vmem:[%s6827_s6] sm:$0xff]  }
  0xf2   : > { %5797 = vmatprep.mubr.msk.bf16.mxu0 %vm792_vm0, %v6886_v48  ;;  %5858 = vmatpush3.bf16.msra.mxu0 %v6605_v62  ;;  %v1501_v48 = vrot.slane %v6618_v42, 1  ;;  %v8265_v62 = vld [vmem:[#allocation7_spill] sm:$0xff]  ;;  %v8268_v42 = vld [vmem:[#allocation10_spill] sm:$0xff] }
  0xf3   : > { %5859 = vmatprep.subr.bf16.mxu0 %v6607_v32 }
  0xf6   : > { %5860 = vmatpush3.bf16.msra.mxu0 %v6607_v32  ;;  %v8266_v32 = vld [vmem:[#allocation8_spill] sm:$0xff] }
  0xf7   : > { %5470 = vmatmul.mubr.msk.bf16.gmra.mrb[40].mxu1 %vm792_vm0, %v7071_v37  ;;  %5925 = vmatprep.subr.bf16.mxu0 %v7528_v34 }
  0xf8   : > { %5473 = vmatprep.mubr.msk.bf16.mxu1 %vm792_vm0, %v7103_v0 }
  0xf9   : > { %5798 = vmatmul.mubr.msk.bf16.gmra.mrb[8].mxu0 %vm792_vm0, %v6898_v55  ;;  %v6619_v55 = vld [vmem:[%s6827_s6 + $0x8] sm:$0xff]  }
  0xfa   : > { %5801 = vmatprep.mubr.msk.bf16.mxu0 %vm792_vm0, %v6922_v1  ;;  %v1502_v1 = vrot.slane %v6619_v55, 1  ;;  %v8270_v55 = vld [vmem:[#allocation12_spill] sm:$0xff] }
  0xff   : > { %5474 = vmatmul.mubr.msk.bf16.gmra.mrb[44].mxu1 %vm792_vm0, %v7114_v17 }
 0x100   : > { %5477 = vmatprep.mubr.msk.bf16.mxu1 %vm792_vm0, %v7142_v49 }
 0x101   : > { %5802 = vmatmul.mubr.msk.bf16.gmra.mrb[12].mxu0 %vm792_vm0, %v6927_v5  ;;  %v1503_v5 = vsel %vm1500_vm2, %v1501_v48, %v1502_v1  ;;  %v8269_v48 = vld [vmem:[#allocation11_spill] sm:$0xff] }
 0x102   : > { %5805 = vmatprep.mubr.msk.bf16.mxu0 %vm792_vm0, %v6949_v18  ;;  %v8261_v18 = vrot.slane %v6843_v14, 1  ;;  %v6612_v14 = vld [vmem:[%s8155_s1 + $0x78] sm:$0xff]  }
 0x107   : > { %5478 = vmatmul.mubr.msk.bf16.gmra.mrb[48].mxu1 %vm792_vm0, %v7153_v38 }
 0x108   : > { %5481 = vmatprep.mubr.msk.bf16.mxu1 %vm792_vm0, %v7182_v22 }
 0x109   : > { %5806 = vmatmul.mubr.msk.bf16.gmra.mrb[16].mxu0 %vm792_vm0, %v6962_v25  ;;  %v1505_v25 = vsel %vm1500_vm2, %v1502_v1, %v8261_v18  ;;  %v8271_v1 = vld [vmem:[#allocation33_spill] sm:$0xff] }
 0x10a   : > { %5809 = vmatprep.mubr.msk.bf16.mxu0 %vm792_vm0, %v6982_v35  ;;  %v6606_v35 = vld [vmem:[%s8155_s1 + $0x68] sm:$0xff]  }
 0x10b   : > { %v8273_v18 = vld [vmem:[#allocation13_spill] sm:$0xff] }
 0x10f   : > { %5482 = vmatmul.mubr.msk.bf16.gmra.mrb[52].mxu1 %vm792_vm0, %v7191_v20 }
 0x110   : > { %5485 = vmatprep.mubr.msk.bf16.mxu1 %vm792_vm0, %v7215_v26 }
 0x111   : > { %5810 = vmatmul.mubr.msk.bf16.gmra.mrb[20].mxu0 %vm792_vm0, %v6987_v39  ;;  %v6610_v39 = vld [vmem:[%s8155_s1 + $0x70] sm:$0xff]  }
 0x112   : > { %5813 = vmatprep.mubr.msk.bf16.mxu0 %vm792_vm0, %v7009_v50  ;;  %v7612_v50 = vld [vmem:[%s8155_s1 + $0x80] sm:$0xff]  }
 0x117   : > { %5486 = vmatmul.mubr.msk.bf16.gmra.mrb[56].mxu1 %vm792_vm0, %v7223_v59 }
 0x118   : > { %5489 = vmatprep.mubr.msk.bf16.mxu1 %vm792_vm0, %v7247_v21 }
 0x119   : > { %5814 = vmatmul.mubr.msk.bf16.gmra.mrb[24].mxu0 %vm792_vm0, %v7014_v56  ;;  %v323_v56 = vld [vmem:[%s6827_s6 + $0x114] sm:$0xf] }
 0x11a   : > { %5817 = vmatprep.mubr.msk.bf16.mxu0 %vm792_vm0, %v7041_v6 }
 0x11f   : > { %5490 = vmatmul.mubr.msk.bf16.gmra.mrb[60].mxu1 %vm792_vm0, %v7255_v27 }
 0x120   : > { %5501 = vmatprep.mubr.msk.bf16.mxu1 %vm792_vm0, %v1503_v5  ;;  %v8272_v5 = vld [vmem:[#allocation34_spill] sm:$0xff] }
 0x121   : > { %5818 = vmatmul.mubr.msk.bf16.gmra.mrb[28].mxu0 %vm792_vm0, %v7044_v13 }
 0x122   : > { %5821 = vmatprep.mubr.msk.bf16.mxu0 %vm792_vm0, %v7062_v24 }
 0x127   : > { %5502 = vmatmul.mubr.msk.bf16.vlgmr.msra.gmra.mrb[0].mxu1 %vm792_vm0, %v1505_v25  ;;  %v8274_v25 = vld [vmem:[#allocation14_spill] sm:$0xff] }
 0x128   : > { %5566 = vmatpush3.bf16.msra.mxu1 %v7378_v30  ;;  %5505 = vmatprep.mubr.msk.bf16.mxu1 %vm792_vm0, %v7086_v47  ;;  %v7651_v47 = vcombine.low %v7464_v4, %v323_v56  ;;  %v8263_v30 = vld [vmem:[#allocation5_spill] sm:$0xff]  ;;  %v8264_v4 = vld [vmem:[#allocation6_spill] sm:$0xff]  ;;  %v8278_v56 = vld [vmem:[#allocation16_spill] sm:$0xff] }
 0x129   : > { %5567 = vmatprep.subr.bf16.mxu1 %v6606_v35  ;;  %5822 = vmatmul.mubr.msk.bf16.gmra.mrb[32].mxu0 %vm792_vm0, %v7071_v37 }
 0x12a   : > { %5825 = vmatprep.mubr.msk.bf16.mxu0 %vm792_vm0, %v7103_v0  ;;  %8262 = vst [vmem:[#allocation44_spill] sm:$0xff] %v7651_v47 }
 0x12c   : > { %5568 = vmatpush3.bf16.msra.mxu1 %v6606_v35  ;;  %v8275_v35 = vld [vmem:[#allocation35_spill] sm:$0xff] }
 0x12d   : > { %5569 = vmatprep.subr.bf16.mxu1 %v6610_v39 }
 0x12f   : > { %5506 = vmatmul.mubr.msk.bf16.gmra.mrb[4].mxu1 %vm792_vm0, %v7100_v57  ;;  %v7660_v57 = vld [vmem:[%s6827_s6 + $0x118] sm:$0xff]  }
 0x130   : > { %5509 = vmatprep.mubr.msk.bf16.mxu1 %vm792_vm0, %v7108_v2  ;;  %5570 = vmatpush3.bf16.msra.mxu1 %v6610_v39  ;;  %v8276_v39 = vld [vmem:[#allocation36_spill] sm:$0xff] }
 0x131   : > { %5571 = vmatprep.subr.bf16.mxu1 %v6612_v14  ;;  %5826 = vmatmul.mubr.msk.bf16.gmra.mrb[36].mxu0 %vm792_vm0, %v7114_v17 }
 0x132   : > { %5829 = vmatprep.mubr.msk.bf16.mxu0 %vm792_vm0, %v7142_v49 }
 0x134   : > { %5572 = vmatpush3.bf16.msra.mxu1 %v6612_v14  ;;  %v8277_v14 = vld [vmem:[#allocation15_spill] sm:$0xff] }
 0x135   : > { %5997 = vmatprep.subr.bf16.mxu1 %v7612_v50 }
 0x137   : > { %5510 = vmatmul.mubr.msk.bf16.gmra.mrb[8].mxu1 %vm792_vm0, %v7139_v41 }
 0x138   : > { %5513 = vmatprep.mubr.msk.bf16.mxu1 %vm792_vm0, %v7147_v52 }
 0x139   : > { %5830 = vmatmul.mubr.msk.bf16.gmra.mrb[40].mxu0 %vm792_vm0, %v7153_v38 }
 0x13a   : > { %5833 = vmatprep.mubr.msk.bf16.mxu0 %vm792_vm0, %v7182_v22 }
 0x13f   : > { %5514 = vmatmul.mubr.msk.bf16.gmra.mrb[12].mxu1 %vm792_vm0, %v7179_v44 }
 0x140   : > { %5517 = vmatprep.mubr.msk.bf16.mxu1 %vm792_vm0, %v7187_v3 }
 0x141   : > { %5834 = vmatmul.mubr.msk.bf16.gmra.mrb[44].mxu0 %vm792_vm0, %v7191_v20 }
 0x142   : > { %5837 = vmatprep.mubr.msk.bf16.mxu0 %vm792_vm0, %v7215_v26 }
 0x147   : > { %5518 = vmatmul.mubr.msk.bf16.gmra.mrb[16].mxu1 %vm792_vm0, %v7212_v40 }
 0x148   : > { %5521 = vmatprep.mubr.msk.bf16.mxu1 %vm792_vm0, %v7220_v53 }
 0x149   : > { %5838 = vmatmul.mubr.msk.bf16.gmra.mrb[48].mxu0 %vm792_vm0, %v7223_v59 }
 0x14a   : > { %5841 = vmatprep.mubr.msk.bf16.mxu0 %vm792_vm0, %v7247_v21 }
 0x14f   : > { %5522 = vmatmul.mubr.msk.bf16.gmra.mrb[20].mxu1 %vm792_vm0, %v7244_v10 }
 0x150   : > { %5525 = vmatprep.mubr.msk.bf16.mxu1 %vm792_vm0, %v7252_v16 }
 0x151   : > { %5842 = vmatmul.mubr.msk.bf16.gmra.mrb[52].mxu0 %vm792_vm0, %v7255_v27 }
 0x152   : > { %5845 = vmatprep.mubr.msk.bf16.mxu0 %vm792_vm0, %v7439_v61 }
 0x157   : > { %5526 = vmatmul.mubr.msk.bf16.gmra.mrb[24].mxu1 %vm792_vm0, %v7279_v12 }
 0x158   : > { %5529 = vmatprep.mubr.msk.bf16.mxu1 %vm792_vm0, %v7284_v54 }
 0x159   : > { %5846 = vmatmul.mubr.msk.bf16.gmra.mrb[56].mxu0 %vm792_vm0, %v7453_v19 }
 0x15a   : > { %5849 = vmatprep.mubr.msk.bf16.mxu0 %vm792_vm0, %v7651_v47 }
 0x15f   : > { %5530 = vmatmul.mubr.msk.bf16.gmra.mrb[28].mxu1 %vm792_vm0, %v7307_v33 }
 0x160   : > { %5533 = vmatprep.mubr.msk.bf16.mxu1 %vm792_vm0, %v7312_v45 }
 0x161   : > { %5850 = vmatmul.mubr.msk.bf16.gmra.mrb[60].mxu0 %vm792_vm0, %v7660_v57 }
 0x162   : > { %5861 = vmatprep.mubr.msk.bf16.mxu0 %vm792_vm0, %v6893_v51  ;;  %v6614_v51 = vld [vmem:[%s8155_s1 + $0x110] sm:$0xff]  }
 0x167   : > { %5534 = vmatmul.mubr.msk.bf16.gmra.mrb[32].mxu1 %vm792_vm0, %v7326_v46 }
 0x168   : > { %5537 = vmatprep.mubr.msk.bf16.mxu1 %vm792_vm0, %v7331_v58 }
 0x169   : > { %5862 = vmatmul.mubr.msk.bf16.vlgmr.msra.gmra.mrb[0].mxu0 %vm792_vm0, %v8263_v30  ;;  %v8280_v30 = vld [vmem:[#allocation39_spill] sm:$0xff] }
 0x16a   : > { %5926 = vmatpush3.bf16.msra.mxu0 %v7528_v34  ;;  %5865 = vmatprep.mubr.msk.bf16.mxu0 %vm792_vm0, %v8264_v4  ;;  %v8267_v34 = vld [vmem:[#allocation9_spill] sm:$0xff] }
 0x16b   : > { %5927 = vmatprep.subr.bf16.mxu0 %v6613_v36  ;;  %v8281_v4 = vld [vmem:[#allocation29_spill] sm:$0xff] }
 0x16e   : > { %5928 = vmatpush3.bf16.msra.mxu0 %v6613_v36  ;;  %v8279_v36 = vld [vmem:[#allocation38_spill] sm:$0xff] }
 0x16f   : > { %5538 = vmatmul.mubr.msk.bf16.gmra.mrb[36].mxu1 %vm792_vm0, %v7345_v8  ;;  %5929 = vmatprep.subr.bf16.mxu0 %v6614_v51 }
 0x170   : > { %5541 = vmatprep.mubr.msk.bf16.mxu1 %vm792_vm0, %v7351_v63 }
 0x171   : > { %5866 = vmatmul.mubr.msk.bf16.gmra.mrb[4].mxu0 %vm792_vm0, %v8265_v62  ;;  %v8283_v62 = vld [vmem:[#allocation18_spill] sm:$0xff] }
 0x172   : > { %5869 = vmatprep.mubr.msk.bf16.mxu0 %vm792_vm0, %v8266_v32  ;;  %5930 = vmatpush3.bf16.msra.mxu0 %v6614_v51  ;;  %v1564_v51 = vrot.slane %v8281_v4, 1  ;;  %v8284_v32 = vld [vmem:[#allocation37_spill] sm:$0xff]  ;;  %v6626_v4 = vld [vmem:[%s6827_s6 + $0x30] sm:$0xff]  }
 0x173   : > { %5931 = vmatprep.subr.bf16.mxu0 %v6615_v15 }
 0x176   : > { %5932 = vmatpush3.bf16.msra.mxu0 %v6615_v15  ;;  %v8282_v15 = vld [vmem:[#allocation17_spill] sm:$0xff] }
 0x177   : > { %5542 = vmatmul.mubr.msk.bf16.gmra.mrb[40].mxu1 %vm792_vm0, %v7368_v23 }
 0x178   : > { %5545 = vmatprep.mubr.msk.bf16.mxu1 %vm792_vm0, %v7373_v11 }
 0x179   : > { %5870 = vmatmul.mubr.msk.bf16.gmra.mrb[8].mxu0 %vm792_vm0, %v8267_v34  ;;  %v1565_v34 = vsel %vm1500_vm2, %v8284_v32, %v1564_v51  ;;  %v6627_v51 = vld [vmem:[%s8155_s1 + $0x98] sm:$0xff]   ;;  %v8290_v32 = vld [vmem:[#allocation24_spill] sm:$0xff] }
 0x17a   : > { %5873 = vmatprep.mubr.msk.bf16.mxu0 %vm792_vm0, %v8268_v42  ;;  %v6621_v42 = vld [vmem:[%s6827_s6 + $0x10] sm:$0xff]  }
 0x17f   : > { %5546 = vmatmul.mubr.msk.bf16.gmra.mrb[44].mxu1 %vm792_vm0, %v7390_v29 }
 0x180   : > { %5549 = vmatprep.mubr.msk.bf16.mxu1 %vm792_vm0, %v7395_v60 }
 0x181   : > { %5874 = vmatmul.mubr.msk.bf16.gmra.mrb[12].mxu0 %vm792_vm0, %v8269_v48  ;;  %v8285_v48 = vld [vmem:[#allocation19_spill] sm:$0xff] }
 0x182   : > { %5877 = vmatprep.mubr.msk.bf16.mxu0 %vm792_vm0, %v8270_v55  ;;  %v8286_v55 = vld [vmem:[#allocation20_spill] sm:$0xff] }
 0x187   : > { %5550 = vmatmul.mubr.msk.bf16.gmra.mrb[48].mxu1 %vm792_vm0, %v8271_v1 }
 0x188   : > { %5553 = vmatprep.mubr.msk.bf16.mxu1 %vm792_vm0, %v8272_v5 }
 0x189   : > { %5878 = vmatmul.mubr.msk.bf16.gmra.mrb[16].mxu0 %vm792_vm0, %v8273_v18  ;;  %v6622_v18 = vld [vmem:[%s6827_s6 + $0x18] sm:$0xff]  }
 0x18a   : > { %5881 = vmatprep.mubr.msk.bf16.mxu0 %vm792_vm0, %v8274_v25  ;;  %v6623_v25 = vld [vmem:[%s8155_s1 + $0x88] sm:$0xff]  }
 0x18f   : > { %5554 = vmatmul.mubr.msk.bf16.gmra.mrb[52].mxu1 %vm792_vm0, %v8275_v35  ;;  %v3360_v35 = vshrl.u32 %v7660_v57, 16 }
 0x190   : > { %5557 = vmatprep.mubr.msk.bf16.mxu1 %vm792_vm0, %v8276_v39  ;;  %v2334_v39 = vshrl.u32 %v7453_v19, 16 }
 0x191   : > { %5882 = vmatmul.mubr.msk.bf16.gmra.mrb[20].mxu0 %vm792_vm0, %v8277_v14  ;;  %v8287_v14 = vld [vmem:[#allocation21_spill] sm:$0xff] }
 0x192   : > { %5885 = vmatprep.mubr.msk.bf16.mxu0 %vm792_vm0, %v8278_v56  ;;  %v8288_v56 = vld [vmem:[#allocation22_spill] sm:$0xff] }
 0x197   : > { %5558 = vmatmul.mubr.msk.bf16.gmra.mrb[56].mxu1 %vm792_vm0, %v8279_v36 }
 0x198   : > { %5561 = vmatprep.mubr.msk.bf16.mxu1 %vm792_vm0, %v8280_v30 }
 0x199   : > { %5886 = vmatmul.mubr.msk.bf16.gmra.mrb[24].mxu0 %vm792_vm0, %v8282_v15  ;;  %v8289_v15 = vld [vmem:[#allocation23_spill] sm:$0xff] }
 0x19a   : > { %5889 = vmatprep.mubr.msk.bf16.mxu0 %vm792_vm0, %v8283_v62 }
 0x19f   : > { %5562 = vmatmul.mubr.msk.bf16.gmra.mrb[60].mxu1 %vm792_vm0, %v1565_v34  ;;  %v6628_v34 = vld [vmem:[%s6827_s6 + $0x38] sm:$0xff]  }
 0x1a0   : > { %5573 = vmatprep.mubr.msk.bf16.mxu1 %vm792_vm0, %v6621_v42  ;;  %v6629_v42 = vld [vmem:[%s6827_s6 + $0x40] sm:$0xff]  }
 0x1a1   : > { %5890 = vmatmul.mubr.msk.bf16.gmra.mrb[28].mxu0 %vm792_vm0, %v8285_v48 }
 0x1a2   : > { %5893 = vmatprep.mubr.msk.bf16.mxu0 %vm792_vm0, %v8286_v55 }
 0x1a7   : > { %5574 = vmatmul.mubr.msk.bf16.vlgmr.msra.gmra.mrb[0].mxu1 %vm792_vm0, %v6622_v18  ;;  %v8291_v18 = vld [vmem:[#allocation25_spill] sm:$0xff] }
 0x1a8   : > { %6001 = vmatpush3.bf16.msra.mxu1 %v7612_v50  ;;  %5577 = vmatprep.mubr.msk.bf16.mxu1 %vm792_vm0, %v7495_v7  ;;  %v6624_v50 = vld [vmem:[%s8155_s1 + $0x90] sm:$0xff]   ;;  %v6625_v7 = vld [vmem:[%s6827_s6 + $0x28] sm:$0xff]  }
 0x1a9   : > { %5998 = vmatprep.subr.bf16.mxu1 %v6623_v25  ;;  %5894 = vmatmul.mubr.msk.bf16.gmra.mrb[32].mxu0 %vm792_vm0, %v8287_v14 }
 0x1aa   : > { %5897 = vmatprep.mubr.msk.bf16.mxu0 %vm792_vm0, %v8288_v56 }
 0x1ac   : > { %6002 = vmatpush3.bf16.msra.mxu1 %v6623_v25  ;;  %v8292_v25 = vld [vmem:[#allocation26_spill] sm:$0xff] }
 0x1ad   : > { %5999 = vmatprep.subr.bf16.mxu1 %v6624_v50 }
 0x1af   : > { %5578 = vmatmul.mubr.msk.bf16.gmra.mrb[4].mxu1 %vm792_vm0, %v6625_v7  ;;  %v6631_v7 = vld [vmem:[%s6827_s6 + $0x50] sm:$0xff]  }
 0x1b0   : > { %5581 = vmatprep.mubr.msk.bf16.mxu1 %vm792_vm0, %v6626_v4  ;;  %6003 = vmatpush3.bf16.msra.mxu1 %v6624_v50  ;;  %v6630_v50 = vld [vmem:[%s6827_s6 + $0x48] sm:$0xff]   ;;  %v8293_v4 = vld [vmem:[#allocation27_spill] sm:$0xff] }
 0x1b1   : > { %6000 = vmatprep.subr.bf16.mxu1 %v6627_v51  ;;  %5898 = vmatmul.mubr.msk.bf16.gmra.mrb[36].mxu0 %vm792_vm0, %v8289_v15 }
 0x1b2   : > { %5901 = vmatprep.mubr.msk.bf16.mxu0 %vm792_vm0, %v8290_v32 }
 0x1b4   : > { %6004 = vmatpush3.bf16.msra.mxu1 %v6627_v51  ;;  %v8294_v51 = vld [vmem:[#allocation28_spill] sm:$0xff] }
 0x1b7   : > { %5582 = vmatmul.mubr.msk.bf16.gmra.mrb[8].mxu1 %vm792_vm0, %v6628_v34  ;;  %v2323_v34 = vshll.u32 %v7439_v61, 16 }
 0x1b8   : > { %5585 = vmatprep.mubr.msk.bf16.mxu1 %vm792_vm0, %v6629_v42  ;;  %v6632_v42 = vld [vmem:[%s6827_s6 + $0x58] sm:$0xff]  }
 0x1b9   : > { %5902 = vmatmul.mubr.msk.bf16.gmra.mrb[40].mxu0 %vm792_vm0, %v8291_v18  ;;  %v2325_v9 = vrot.slane %v2323_v34, 1 }
 0x1ba   : > { %5905 = vmatprep.mubr.msk.bf16.mxu0 %vm792_vm0, %v8292_v25 }
 0x1bf   : > { %5586 = vmatmul.mubr.msk.bf16.gmra.mrb[12].mxu1 %vm792_vm0, %v6630_v50  ;;  %v2327_v50 = vshrl.u32 %v7439_v61, 16 }
 0x1c0   : > { %5589 = vmatprep.mubr.msk.bf16.mxu1 %vm792_vm0, %v6631_v7  ;;  %v2330_v7 = vshll.u32 %v7453_v19, 16 }
 0x1c1   : > { %5906 = vmatmul.mubr.msk.bf16.gmra.mrb[44].mxu0 %vm792_vm0, %v8293_v4  ;;  %v2329_v30 = vor.u32 %v2327_v50, %v2325_v9  ;;  %v3353_v50 = vshrl.u32 %v7651_v47, 16 }
 0x1c2   : > { %5909 = vmatprep.mubr.msk.bf16.mxu0 %vm792_vm0, %v8294_v51  ;;  %v2332_v36 = vrot.slane %v2330_v7, 1  ;;  %v3349_v51 = vshll.u32 %v7651_v47, 16  ;;  %v3356_v7 = vshll.u32 %v7660_v57, 16 }
 0x1c4   : > { %v7810_v34 = vsel %vm507_vm1, %v2329_v30, %v2332_v36  ;;  %v6636_v30 = vld [vmem:[%s6827_s6 + $0x78] sm:$0xff]  }
 0x1c7   : > { %5590 = vmatmul.mubr.msk.bf16.gmra.mrb[16].mxu1 %vm792_vm0, %v6632_v42  ;;  %v6634_v42 = vld [vmem:[%s6827_s6 + $0x68] sm:$0xff]  }
 0x1c8   : > { %5593 = vmatprep.mubr.msk.bf16.mxu1 %vm792_vm0, %v6633_v28  ;;  %v8297_v28 = vld [vmem:[#allocation32_spill] sm:$0xff] }
 0x1c9   : > { %5910 = vmatmul.mubr.msk.bf16.gmra.mrb[48].mxu0 %vm792_vm0, %v8295_v43  ;;  %v7804_v4 = vsel %vm507_vm1, %v8297_v28, %v2325_v9  ;;  %v6635_v43 = vld [vmem:[%s6827_s6 + $0x70] sm:$0xff]   ;;  %v7818_v9 = vor.u32 %v2334_v39, %v2332_v36  ;;  %v7821_v28 = vld [vmem:[%s6827_s6 + $0x120] ss:$0 sps:$4 sm:$0xff]  }
 0x1ca   : > { %5913 = vmatprep.mubr.msk.bf16.mxu0 %vm792_vm0, %v8296_v31  ;;  %8298 = vst [vmem:[#allocation5_spill] sm:$0xff] %v7804_v4  ;;  %v3358_v31 = vrot.slane %v3356_v7, 1  ;;  %v6638_v7 = vld [vmem:[%s6827_s6 + $0x88] sm:$0xff]  }
 0x1cc   : > { %v3362_v36 = vor.u32 %v3360_v35, %v3358_v31 }
 0x1cf   : > { %5594 = vmatmul.mubr.msk.bf16.gmra.mrb[20].mxu1 %vm792_vm0, %v6634_v42  ;;  %v3351_v42 = vrot.slane %v3349_v51, 1  ;;  %v3364_v51 = vshll.u32 %v7821_v28, 16 }
 0x1d0   : > { %5597 = vmatprep.mubr.msk.bf16.mxu1 %vm792_vm0, %v6635_v43 }
 0x1d1   : > { %5914 = vmatmul.mubr.msk.bf16.gmra.mrb[52].mxu0 %vm792_vm0, %v7804_v4  ;;  %v3355_v43 = vor.u32 %v3353_v50, %v3351_v42  ;;  %v3352_v47 = vsel %vm507_vm1, %v7818_v9, %v3351_v42  ;;  %v6637_v4 = vld [vmem:[%s6827_s6 + $0x80] sm:$0xff]   ;;  %v3366_v50 = vrot.slane %v3364_v51, 1 }
 0x1d2   : > { %5917 = vmatprep.mubr.msk.bf16.mxu0 %vm792_vm0, %v7810_v34 }
 0x1d3   : > { %v3359_v39 = vsel %vm507_vm1, %v3355_v43, %v3358_v31  ;;  %v3367_v42 = vsel %vm507_vm1, %v3362_v36, %v3366_v50  ;;  %v8000_v36 = vld [vmem:[%s8157_s3] ss:$0 sm:$0xff] }
 0x1d7   : > { %5598 = vmatmul.mubr.msk.bf16.gmra.mrb[24].mxu1 %vm792_vm0, %v6636_v30  ;;  %v7995_v30 = vld [vmem:[%s8156_s2] ss:$0 sm:$0xff] }
 0x1d8   : > { %5601 = vmatprep.mubr.msk.bf16.mxu1 %vm792_vm0, %v6637_v4 }
 0x1d9   : > { %5918 = vmatmul.mubr.msk.bf16.gmra.mrb[56].mxu0 %vm792_vm0, %v3352_v47 }
 0x1da   : > { %5921 = vmatprep.mubr.msk.bf16.mxu0 %vm792_vm0, %v3359_v39 }
 0x1df   : > { %5602 = vmatmul.mubr.msk.bf16.gmra.mrb[28].mxu1 %vm792_vm0, %v6638_v7 }
 0x1e0   : > { %5605 = vmatprep.mubr.msk.bf16.mxu1 %vm792_vm0, %v7041_v6  ;;  %v8302_v6 = vld [vmem:[#allocation28_spill] sm:$0xff] }
 0x1e1   : > { %5922 = vmatmul.mubr.msk.bf16.gmra.mrb[60].mxu0 %vm792_vm0, %v3367_v42 }
 0x1e2   : > { %5933 = vmatprep.mubr.msk.bf16.mxu0 %vm792_vm0, %v7108_v2  ;;  %v8307_v2 = vld [vmem:[#allocation41_spill] sm:$0xff] }
 0x1e7   : > { %5606 = vmatmul.mubr.msk.bf16.gmra.mrb[32].mxu1 %vm792_vm0, %v7044_v13  ;;  %v8303_v13 = vld [vmem:[#allocation38_spill] sm:$0xff] }
 0x1e8   : > { %5609 = vmatprep.mubr.msk.bf16.mxu1 %vm792_vm0, %v7062_v24  ;;  %v8304_v24 = vld [vmem:[#allocation39_spill] sm:$0xff] }
 0x1e9   : > { %5934 = vmatmul.mubr.msk.bf16.vlgmr.msra.gmra.mrb[0].mxu0 %vm792_vm0, %v7139_v41 }
 0x1ea   : > { %5937 = vmatprep.mubr.msk.bf16.mxu0 %vm792_vm0, %v7147_v52  ;;  %v8310_v52 = vld [vmem:[#allocation42_spill] sm:$0xff] }
 0x1ef   : > { %5610 = vmatmul.mubr.msk.bf16.gmra.mrb[36].mxu1 %vm792_vm0, %v7071_v37  ;;  %v8305_v37 = vld [vmem:[#allocation30_spill] sm:$0xff] }
 0x1f0   : > { %5613 = vmatprep.mubr.msk.bf16.mxu1 %vm792_vm0, %v7103_v0  ;;  %v8306_v0 = vld [vmem:[#allocation31_spill] sm:$0xff] }
 0x1f1   : > { %5938 = vmatmul.mubr.msk.bf16.gmra.mrb[4].mxu0 %vm792_vm0, %v7179_v44 }
 0x1f2   : > { %5941 = vmatprep.mubr.msk.bf16.mxu0 %vm792_vm0, %v7187_v3 }
 0x1f7   : > { %5614 = vmatmul.mubr.msk.bf16.gmra.mrb[40].mxu1 %vm792_vm0, %v7114_v17  ;;  %v8308_v17 = vld [vmem:[#allocation43_spill] sm:$0xff] }
 0x1f8   : > { %5617 = vmatprep.mubr.msk.bf16.mxu1 %vm792_vm0, %v7142_v49  ;;  %v3701_v49 = vrot.slane %v7660_v57, 1 }
 0x1f9   : > { %5942 = vmatmul.mubr.msk.bf16.gmra.mrb[8].mxu0 %vm792_vm0, %v7212_v40  ;;  %v8312_v40 = vld [vmem:[#allocation40_spill] sm:$0xff] }
 0x1fa   : > { %5945 = vmatprep.mubr.msk.bf16.mxu0 %vm792_vm0, %v7220_v53 }
 0x1ff   : > { %5618 = vmatmul.mubr.msk.bf16.gmra.mrb[44].mxu1 %vm792_vm0, %v7153_v38  ;;  %v2338_v38 = vshll.u32 %v8310_v52, 16 }
 0x200   : > { %5621 = vmatprep.mubr.msk.bf16.mxu1 %vm792_vm0, %v7182_v22  ;;  %v8309_v22 = vld [vmem:[#allocation44_spill] sm:$0xff] }
 0x201   : > { %5946 = vmatmul.mubr.msk.bf16.gmra.mrb[12].mxu0 %vm792_vm0, %v7244_v10  ;;  %v3699_v41 = vrot.slane %v8309_v22, 1  ;;  %v2340_v10 = vrot.slane %v2338_v38, 1 }
 0x202   : > { %5949 = vmatprep.mubr.msk.bf16.mxu0 %vm792_vm0, %v7252_v16 }
 0x203   : > { %v3700_v44 = vsel %vm1500_vm2, %v8312_v40, %v3699_v41  ;;  %v3702_v3 = vsel %vm1500_vm2, %v3699_v41, %v3701_v49  ;;  %v2341_v53 = vsel %vm507_vm1, %v7818_v9, %v2340_v10 }
 0x207   : > { %5622 = vmatmul.mubr.msk.bf16.gmra.mrb[48].mxu1 %vm792_vm0, %v7191_v20  ;;  %v8311_v20 = vld [vmem:[#allocation5_spill] sm:$0xff] }
 0x208   : > { %5625 = vmatprep.mubr.msk.bf16.mxu1 %vm792_vm0, %v7215_v26  ;;  %v3703_v26 = vrot.slane %v7821_v28, 1 }
 0x209   : > { %5950 = vmatmul.mubr.msk.bf16.gmra.mrb[16].mxu0 %vm792_vm0, %v7279_v12  ;;  %v8299_v12 = vld [vmem:[#allocation35_spill] sm:$0xff] }
 0x20a   : > { %5953 = vmatprep.mubr.msk.bf16.mxu0 %vm792_vm0, %v7284_v54 }
 0x20f   : > { %5626 = vmatmul.mubr.msk.bf16.gmra.mrb[52].mxu1 %vm792_vm0, %v7223_v59  ;;  %v8301_v59 = vld [vmem:[#allocation27_spill] sm:$0xff] }
 0x210   : > { %5629 = vmatprep.mubr.msk.bf16.mxu1 %vm792_vm0, %v7247_v21  ;;  %v3704_v21 = vsel %vm1500_vm2, %v3701_v49, %v3703_v26 }
 0x211   : > { %5954 = vmatmul.mubr.msk.bf16.gmra.mrb[20].mxu0 %vm792_vm0, %v7307_v33 }
 0x212   : > { %5957 = vmatprep.mubr.msk.bf16.mxu0 %vm792_vm0, %v7312_v45 }
 0x217   : > { %5630 = vmatmul.mubr.msk.bf16.gmra.mrb[56].mxu1 %vm792_vm0, %v7255_v27  ;;  %v8300_v27 = vld [vmem:[#allocation36_spill] sm:$0xff] }
 0x218   : > { %5633 = vmatprep.mubr.msk.bf16.mxu1 %vm792_vm0, %v7439_v61 }
 0x219   : > { %5958 = vmatmul.mubr.msk.bf16.gmra.mrb[24].mxu0 %vm792_vm0, %v7326_v46 }
 0x21a   : > { %5961 = vmatprep.mubr.msk.bf16.mxu0 %vm792_vm0, %v7331_v58 }
 0x21f   : > { %5634 = vmatmul.mubr.msk.bf16.gmra.mrb[60].mxu1 %vm792_vm0, %v7453_v19 }
 0x220   : > { %5677 = vmatprep.mubr.msk.bf16.mxu1 %vm792_vm0, %v8283_v62 }
 0x221   : > { %5962 = vmatmul.mubr.msk.bf16.gmra.mrb[28].mxu0 %vm792_vm0, %v7345_v8 }
 0x222   : > { %5965 = vmatprep.mubr.msk.bf16.mxu0 %vm792_vm0, %v7351_v63 }
 0x227   : > { %5678 = vmatmul.mubr.msk.bf16.vlgmr.msra.gmra.mrb[32].mxu1 %vm792_vm0, %v8285_v48 }
 0x228   : > { %5681 = vmatprep.mubr.msk.bf16.mxu1 %vm792_vm0, %v8286_v55 }
 0x229   : > { %5966 = vmatmul.mubr.msk.bf16.gmra.mrb[32].mxu0 %vm792_vm0, %v7368_v23 }
 0x22a   : > { %5969 = vmatprep.mubr.msk.bf16.mxu0 %vm792_vm0, %v7373_v11 }
 0x22f   : > { %5682 = vmatmul.mubr.msk.bf16.gmra.mrb[36].mxu1 %vm792_vm0, %v8287_v14 }
 0x230   : > { %5685 = vmatprep.mubr.msk.bf16.mxu1 %vm792_vm0, %v8288_v56 }
 0x231   : > { %5970 = vmatmul.mubr.msk.bf16.gmra.mrb[36].mxu0 %vm792_vm0, %v7390_v29 }
 0x232   : > { %5973 = vmatprep.mubr.msk.bf16.mxu0 %vm792_vm0, %v7395_v60 }
 0x237   : > { %5686 = vmatmul.mubr.msk.bf16.gmra.mrb[40].mxu1 %vm792_vm0, %v8289_v15 }
 0x238   : > { %5689 = vmatprep.mubr.msk.bf16.mxu1 %vm792_vm0, %v8290_v32 }
 0x239   : > { %5974 = vmatmul.mubr.msk.bf16.gmra.mrb[40].mxu0 %vm792_vm0, %v8271_v1 }
 0x23a   : > { %5977 = vmatprep.mubr.msk.bf16.mxu0 %vm792_vm0, %v8272_v5 }
 0x23f   : > { %5690 = vmatmul.mubr.msk.bf16.gmra.mrb[44].mxu1 %vm792_vm0, %v8291_v18 }
 0x240   : > { %5693 = vmatprep.mubr.msk.bf16.mxu1 %vm792_vm0, %v8292_v25 }
 0x241   : > { %5978 = vmatmul.mubr.msk.bf16.gmra.mrb[44].mxu0 %vm792_vm0, %v8299_v12 }
 0x242   : > { %5981 = vmatprep.mubr.msk.bf16.mxu0 %vm792_vm0, %v8300_v27 }
 0x247   : > { %5694 = vmatmul.mubr.msk.bf16.gmra.mrb[48].mxu1 %vm792_vm0, %v8301_v59 }
 0x248   : > { %5697 = vmatprep.mubr.msk.bf16.mxu1 %vm792_vm0, %v8302_v6 }
 0x249   : > { %5982 = vmatmul.mubr.msk.bf16.gmra.mrb[48].mxu0 %vm792_vm0, %v8303_v13 }
 0x24a   : > { %5985 = vmatprep.mubr.msk.bf16.mxu0 %vm792_vm0, %v8304_v24 }
 0x24f   : > { %5698 = vmatmul.mubr.msk.bf16.gmra.mrb[52].mxu1 %vm792_vm0, %v8305_v37 }
 0x250   : > { %5701 = vmatprep.mubr.msk.bf16.mxu1 %vm792_vm0, %v8306_v0 }
 0x251   : > { %5986 = vmatmul.mubr.msk.bf16.gmra.mrb[52].mxu0 %vm792_vm0, %v8307_v2 }
 0x252   : > { %5989 = vmatprep.mubr.msk.bf16.mxu0 %vm792_vm0, %v8308_v17 }
 0x257   : > { %5702 = vmatmul.mubr.msk.bf16.gmra.mrb[56].mxu1 %vm792_vm0, %v8311_v20 }
 0x258   : > { %5705 = vmatprep.mubr.msk.bf16.mxu1 %vm792_vm0, %v7810_v34 }
 0x259   : > { %5990 = vmatmul.mubr.msk.bf16.gmra.mrb[56].mxu0 %vm792_vm0, %v3700_v44 }
 0x25a   : > { %5993 = vmatprep.mubr.msk.bf16.mxu0 %vm792_vm0, %v3702_v3 }
 0x25f   : > { %5706 = vmatmul.mubr.msk.bf16.gmra.mrb[60].mxu1 %vm792_vm0, %v2341_v53 }
 0x261   : > { %5994 = vmatmul.mubr.msk.bf16.gmra.mrb[60].mxu0 %vm792_vm0, %v3704_v21 }
 0x27a   : > { %v5575_v16 = vpop.f32.mrb[0].mxu1 }
 0x27b   : > { %v2056_v54 = vpop.f32.mrb[1].mxu1 }
 0x27c   : > { %v5576_v33 = vpop.f32.mrb[2].mxu1 }
 0x27d   : > { %v2059_v45 = vpop.f32.mrb[3].mxu1 }
 0x282   : > { %v5579_v46 = vpop.f32.mrb[4].mxu1 }
 0x283   : > { %v2070_v58 = vpop.f32.mrb[5].mxu1 }
 0x284   : > { %v5580_v8 = vpop.f32.mrb[6].mxu1 }
 0x285   : > { %v2073_v63 = vpop.f32.mrb[7].mxu1 }
 0x28a   : > { %v5583_v23 = vpop.f32.mrb[8].mxu1 }
 0x28b   : > { %v2084_v11 = vpop.f32.mrb[9].mxu1 }
 0x28c   : > { %v5584_v29 = vpop.f32.mrb[10].mxu1 }
 0x28d   : > { %v2087_v60 = vpop.f32.mrb[11].mxu1 }
 0x292   : > { %v5587_v19 = vpop.f32.mrb[12].mxu1 }
 0x293   : > { %v7972_v61 = vpop.f32.mrb[13].mxu1 }
 0x294   : > { %v5588_v31 = vpop.f32.mrb[14].mxu1 }
 0x295   : > { %v7974_v47 = vpop.f32.mrb[15].mxu1 }
 0x29a   : > { %v5591_v57 = vpop.f32.mrb[16].mxu1 }
 0x29b   : > { %v7976_v1 = vpop.f32.mrb[17].mxu1 }
 0x29c   : > { %v5592_v5 = vpop.f32.mrb[18].mxu1 }
 0x29d   : > { %v7978_v35 = vpop.f32.mrb[19].mxu1 }
 0x2a2   : > { %v5595_v62 = vpop.f32.mrb[20].mxu1 }
 0x2a3   : > { %v7980_v48 = vpop.f32.mrb[21].mxu1 }
 0x2a4   : > { %v5596_v55 = vpop.f32.mrb[22].mxu1 }
 0x2a5   : > { %v7982_v14 = vpop.f32.mrb[23].mxu1 }
 0x2aa   : > { %v5599_v56 = vpop.f32.mrb[24].mxu1 }
 0x2ab   : > { %v7984_v15 = vpop.f32.mrb[25].mxu1 }
 0x2ac   : > { %v5600_v32 = vpop.f32.mrb[26].mxu1 }
 0x2ad   : > { %v7986_v18 = vpop.f32.mrb[27].mxu1 }
 0x2b2   : > { %v5603_v25 = vpop.f32.mrb[28].mxu1 }
 0x2b3   : > { %v7988_v4 = vpop.f32.mrb[29].mxu1 }
 0x2b4   : > { %v5604_v34 = vpop.f32.mrb[30].mxu1 }
 0x2b5   : > { %v7990_v9 = vpop.f32.mrb[31].mxu1 }
 0x2bc   : > { %v5935_v28 = vpop.f32.mrb[0].mxu0 }
 0x2bd   : > { %v3772_v43 = vpop.f32.mrb[1].mxu0 }
 0x2be   : > { %v6005_v51 = vadd.f32 %v3772_v43, %v2056_v54  ;;  %v5936_v39 = vpop.f32.mrb[2].mxu0 }
 0x2bf   : > { %v3775_v50 = vpop.f32.mrb[3].mxu0 }
 0x2c0   : > { %v4034_v7 = vmul.f32 %v6005_v51, %v7995_v30  ;;  %v6006_v42 = vadd.f32 %v3775_v50, %v2059_v45 }
 0x2c2   : > { %v4073_v12 = vadd.f32 %v8000_v36, %v4034_v7  ;;  %v4035_v27 = vmul.f32 %v6006_v42, %v7995_v30 }
 0x2c4   : > { %v4074_v59 = vadd.f32 %v8000_v36, %v4035_v27  ;;  %v5939_v6 = vpop.f32.mrb[4].mxu0  ;;  %v4105_v24 = vmax.f32 %v4073_v12, 0.0 }
 0x2c5   : > { %v3786_v13 = vpop.f32.mrb[5].mxu0 }
 0x2c6   : > { %v4106_v37 = vmax.f32 %v4074_v59, 0.0  ;;  %v6007_v0 = vadd.f32 %v3786_v13, %v2070_v58  ;;  %v5940_v2 = vpop.f32.mrb[6].mxu0 }
 0x2c7   : > { %v3789_v17 = vpop.f32.mrb[7].mxu0 }
 0x2c8   : > { %v4933_v22 = vpack.c.bf16 %v4106_v37, %v4105_v24  ;;  %v4036_v41 = vmul.f32 %v6007_v0, %v7995_v30  ;;  %v6008_v49 = vadd.f32 %v3789_v17, %v2073_v63 }
 0x2ca   : > { %4934 = vst [vmem:[%s8010_s26] sm:$0xff] %v4933_v22   ;;  %v4075_v52 = vadd.f32 %v8000_v36, %v4036_v41  ;;  %v4037_v38 = vmul.f32 %v6008_v49, %v7995_v30 }
 0x2cc   : > { %v4076_v20 = vadd.f32 %v8000_v36, %v4037_v38  ;;  %v5943_v40 = vpop.f32.mrb[8].mxu0  ;;  %v4107_v3 = vmax.f32 %v4075_v52, 0.0 }
 0x2cd   : > { %v3800_v44 = vpop.f32.mrb[9].mxu0 }
 0x2ce   : > { %v4108_v10 = vmax.f32 %v4076_v20, 0.0  ;;  %v6009_v26 = vadd.f32 %v3800_v44, %v2084_v11  ;;  %v5944_v53 = vpop.f32.mrb[10].mxu0 }
 0x2cf   : > { %v3803_v21 = vpop.f32.mrb[11].mxu0 }
 0x2d0   : > { %v4938_v16 = vpack.c.bf16 %v4108_v10, %v4107_v3  ;;  %v4038_v54 = vmul.f32 %v6009_v26, %v7995_v30  ;;  %v6010_v33 = vadd.f32 %v3803_v21, %v2087_v60 }
 0x2d2   : > { %5010 = vst [vmem:[%s8010_s26 + $0x8] sm:$0xff] %v4938_v16   ;;  %v4077_v45 = vadd.f32 %v8000_v36, %v4038_v54  ;;  %v4039_v46 = vmul.f32 %v6010_v33, %v7995_v30 }
 0x2d4   : > { %v4078_v58 = vadd.f32 %v8000_v36, %v4039_v46  ;;  %v5947_v8 = vpop.f32.mrb[12].mxu0  ;;  %v4109_v23 = vmax.f32 %v4077_v45, 0.0 }
 0x2d5   : > { %v3814_v63 = vpop.f32.mrb[13].mxu0 }
 0x2d6   : > { %v4110_v29 = vmax.f32 %v4078_v58, 0.0  ;;  %v6011_v11 = vadd.f32 %v3814_v63, %v7972_v61  ;;  %v5948_v19 = vpop.f32.mrb[14].mxu0 }
 0x2d7   : > { %v3817_v31 = vpop.f32.mrb[15].mxu0 }
 0x2d8   : > { %v4943_v57 = vpack.c.bf16 %v4110_v29, %v4109_v23  ;;  %v4040_v5 = vmul.f32 %v6011_v11, %v7995_v30  ;;  %v6012_v60 = vadd.f32 %v3817_v31, %v7974_v47 }
 0x2da   : > { %5011 = vst [vmem:[%s8010_s26 + $0x10] sm:$0xff] %v4943_v57   ;;  %v4079_v62 = vadd.f32 %v8000_v36, %v4040_v5  ;;  %v4041_v55 = vmul.f32 %v6012_v60, %v7995_v30 }
 0x2dc   : > { %v4080_v56 = vadd.f32 %v8000_v36, %v4041_v55  ;;  %v5951_v32 = vpop.f32.mrb[16].mxu0  ;;  %v4111_v34 = vmax.f32 %v4079_v62, 0.0 }
 0x2dd   : > { %v3828_v25 = vpop.f32.mrb[17].mxu0 }
 0x2de   : > { %v4112_v28 = vmax.f32 %v4080_v56, 0.0  ;;  %v6013_v61 = vadd.f32 %v3828_v25, %v7976_v1  ;;  %v5952_v43 = vpop.f32.mrb[18].mxu0 }
 0x2df   : > { %v3831_v51 = vpop.f32.mrb[19].mxu0 }
 0x2e0   : > { %v4948_v39 = vpack.c.bf16 %v4112_v28, %v4111_v34  ;;  %v4042_v50 = vmul.f32 %v6013_v61, %v7995_v30  ;;  %v6014_v47 = vadd.f32 %v3831_v51, %v7978_v35 }
 0x2e2   : > { %5012 = vst [vmem:[%s8010_s26 + $0x18] sm:$0xff] %v4948_v39   ;;  %v4081_v7 = vadd.f32 %v8000_v36, %v4042_v50  ;;  %v4043_v42 = vmul.f32 %v6014_v47, %v7995_v30 }
 0x2e4   : > { %v4082_v12 = vadd.f32 %v8000_v36, %v4043_v42  ;;  %v5955_v27 = vpop.f32.mrb[20].mxu0  ;;  %v4113_v6 = vmax.f32 %v4081_v7, 0.0 }
 0x2e5   : > { %v3842_v59 = vpop.f32.mrb[21].mxu0 }
 0x2e6   : > { %v4114_v13 = vmax.f32 %v4082_v12, 0.0  ;;  %v6015_v1 = vadd.f32 %v3842_v59, %v7980_v48  ;;  %v5956_v24 = vpop.f32.mrb[22].mxu0 }
 0x2e7   : > { %v3845_v37 = vpop.f32.mrb[23].mxu0 }
 0x2e8   : > { %v4953_v0 = vpack.c.bf16 %v4114_v13, %v4113_v6  ;;  %v4044_v2 = vmul.f32 %v6015_v1, %v7995_v30  ;;  %v6016_v35 = vadd.f32 %v3845_v37, %v7982_v14 }
 0x2ea   : > { %5013 = vst [vmem:[%s8010_s26 + $0x20] sm:$0xff] %v4953_v0   ;;  %v4083_v17 = vadd.f32 %v8000_v36, %v4044_v2  ;;  %v4045_v22 = vmul.f32 %v6016_v35, %v7995_v30 }
 0x2ec   : > { %v4084_v41 = vadd.f32 %v8000_v36, %v4045_v22  ;;  %v5959_v49 = vpop.f32.mrb[24].mxu0  ;;  %v4115_v38 = vmax.f32 %v4083_v17, 0.0 }
 0x2ed   : > { %v3856_v52 = vpop.f32.mrb[25].mxu0 }
 0x2ee   : > { %v4116_v20 = vmax.f32 %v4084_v41, 0.0  ;;  %v6017_v48 = vadd.f32 %v3856_v52, %v7984_v15  ;;  %v5960_v40 = vpop.f32.mrb[26].mxu0 }
 0x2ef   : > { %v3859_v44 = vpop.f32.mrb[27].mxu0 }
 0x2f0   : > { %v4958_v3 = vpack.c.bf16 %v4116_v20, %v4115_v38  ;;  %v4046_v10 = vmul.f32 %v6017_v48, %v7995_v30  ;;  %v6018_v14 = vadd.f32 %v3859_v44, %v7986_v18 }
 0x2f2   : > { %5014 = vst [vmem:[%s8010_s26 + $0x28] sm:$0xff] %v4958_v3   ;;  %v4085_v26 = vadd.f32 %v8000_v36, %v4046_v10  ;;  %v4047_v53 = vmul.f32 %v6018_v14, %v7995_v30 }
 0x2f4   : > { %v4086_v21 = vadd.f32 %v8000_v36, %v4047_v53  ;;  %v5963_v16 = vpop.f32.mrb[28].mxu0  ;;  %v4117_v33 = vmax.f32 %v4085_v26, 0.0 }
 0x2f5   : > { %v3870_v54 = vpop.f32.mrb[29].mxu0 }
 0x2f6   : > { %v4118_v45 = vmax.f32 %v4086_v21, 0.0  ;;  %v6019_v15 = vadd.f32 %v3870_v54, %v7988_v4  ;;  %v5964_v46 = vpop.f32.mrb[30].mxu0 }
 0x2f7   : > { %v3873_v58 = vpop.f32.mrb[31].mxu0 }
 0x2f8   : > { %v4963_v8 = vpack.c.bf16 %v4118_v45, %v4117_v33  ;;  %v4048_v63 = vmul.f32 %v6019_v15, %v7995_v30  ;;  %v6020_v18 = vadd.f32 %v3873_v58, %v7990_v9 }
 0x2fa   : > { %v5679_v23 = vpop.f32.mrb[32].mxu1  ;;  %5015 = vst [vmem:[%s8010_s26 + $0x30] sm:$0xff] %v4963_v8   ;;  %v4087_v29 = vadd.f32 %v8000_v36, %v4048_v63  ;;  %v4049_v11 = vmul.f32 %v6020_v18, %v7995_v30 }
 0x2fb   : > { %v2521_v19 = vpop.f32.mrb[33].mxu1 }
 0x2fc   : > { %v5680_v31 = vpop.f32.mrb[34].mxu1  ;;  %v4088_v57 = vadd.f32 %v8000_v36, %v4049_v11  ;;  %v5967_v5 = vpop.f32.mrb[32].mxu0  ;;  %v4119_v62 = vmax.f32 %v4087_v29, 0.0 }
 0x2fd   : > { %v2524_v4 = vpop.f32.mrb[35].mxu1  ;;  %v3884_v60 = vpop.f32.mrb[33].mxu0 }
 0x2fe   : > { %v4120_v55 = vmax.f32 %v4088_v57, 0.0  ;;  %v6021_v56 = vadd.f32 %v3884_v60, %v2521_v19  ;;  %v5968_v32 = vpop.f32.mrb[34].mxu0 }
 0x2ff   : > { %v3887_v25 = vpop.f32.mrb[35].mxu0 }
 0x300   : > { %v4968_v9 = vpack.c.bf16 %v4120_v55, %v4119_v62  ;;  %v4050_v34 = vmul.f32 %v6021_v56, %v7995_v30  ;;  %v6022_v28 = vadd.f32 %v3887_v25, %v2524_v4 }
 0x302   : > { %v5683_v61 = vpop.f32.mrb[36].mxu1  ;;  %5016 = vst [vmem:[%s8010_s26 + $0x38] sm:$0xff] %v4968_v9   ;;  %v4089_v43 = vadd.f32 %v8000_v36, %v4050_v34  ;;  %v4051_v51 = vmul.f32 %v6022_v28, %v7995_v30 }
 0x303   : > { %v2535_v39 = vpop.f32.mrb[37].mxu1 }
 0x304   : > { %v5684_v50 = vpop.f32.mrb[38].mxu1  ;;  %v4090_v47 = vadd.f32 %v8000_v36, %v4051_v51  ;;  %v5971_v7 = vpop.f32.mrb[36].mxu0  ;;  %v4121_v27 = vmax.f32 %v4089_v43, 0.0 }
 0x305   : > { %v2538_v42 = vpop.f32.mrb[39].mxu1  ;;  %v3898_v12 = vpop.f32.mrb[37].mxu0 }
 0x306   : > { %v4122_v59 = vmax.f32 %v4090_v47, 0.0  ;;  %v6023_v6 = vadd.f32 %v3898_v12, %v2535_v39  ;;  %v5972_v13 = vpop.f32.mrb[38].mxu0 }
 0x307   : > { %v3901_v1 = vpop.f32.mrb[39].mxu0 }
 0x308   : > { %v4973_v24 = vpack.c.bf16 %v4122_v59, %v4121_v27  ;;  %v4052_v37 = vmul.f32 %v6023_v6, %v7995_v30  ;;  %v6024_v0 = vadd.f32 %v3901_v1, %v2538_v42 }
 0x30a   : > { %v5687_v2 = vpop.f32.mrb[40].mxu1  ;;  %5017 = vst [vmem:[%s8010_s26 + $0x40] sm:$0xff] %v4973_v24   ;;  %v4091_v35 = vadd.f32 %v8000_v36, %v4052_v37  ;;  %v4053_v17 = vmul.f32 %v6024_v0, %v7995_v30 }
 0x30b   : > { %v2549_v22 = vpop.f32.mrb[41].mxu1 }
 0x30c   : > { %v5688_v41 = vpop.f32.mrb[42].mxu1  ;;  %v4092_v49 = vadd.f32 %v8000_v36, %v4053_v17  ;;  %v5975_v52 = vpop.f32.mrb[40].mxu0  ;;  %v4123_v48 = vmax.f32 %v4091_v35, 0.0 }
 0x30d   : > { %v2552_v38 = vpop.f32.mrb[43].mxu1  ;;  %v3912_v20 = vpop.f32.mrb[41].mxu0 }
 0x30e   : > { %v4124_v40 = vmax.f32 %v4092_v49, 0.0  ;;  %v6025_v44 = vadd.f32 %v3912_v20, %v2549_v22  ;;  %v5976_v3 = vpop.f32.mrb[42].mxu0 }
 0x30f   : > { %v3915_v10 = vpop.f32.mrb[43].mxu0 }
 0x310   : > { %v4978_v14 = vpack.c.bf16 %v4124_v40, %v4123_v48  ;;  %v4054_v26 = vmul.f32 %v6025_v44, %v7995_v30  ;;  %v6026_v53 = vadd.f32 %v3915_v10, %v2552_v38 }
 0x312   : > { %v5691_v21 = vpop.f32.mrb[44].mxu1  ;;  %5018 = vst [vmem:[%s8010_s26 + $0x48] sm:$0xff] %v4978_v14   ;;  %v4093_v16 = vadd.f32 %v8000_v36, %v4054_v26  ;;  %v4055_v54 = vmul.f32 %v6026_v53, %v7995_v30 }
 0x313   : > { %v2563_v33 = vpop.f32.mrb[45].mxu1 }
 0x314   : > { %v5692_v45 = vpop.f32.mrb[46].mxu1  ;;  %v4094_v15 = vadd.f32 %v8000_v36, %v4055_v54  ;;  %v5979_v46 = vpop.f32.mrb[44].mxu0  ;;  %v4125_v63 = vmax.f32 %v4093_v16, 0.0 }
 0x315   : > { %v2566_v58 = vpop.f32.mrb[47].mxu1  ;;  %v3926_v8 = vpop.f32.mrb[45].mxu0 }
 0x316   : > { %v4126_v18 = vmax.f32 %v4094_v15, 0.0  ;;  %v6027_v23 = vadd.f32 %v3926_v8, %v2563_v33  ;;  %v5980_v29 = vpop.f32.mrb[46].mxu0 }
 0x317   : > { %v3929_v11 = vpop.f32.mrb[47].mxu0 }
 0x318   : > { %v4983_v19 = vpack.c.bf16 %v4126_v18, %v4125_v63  ;;  %v4056_v31 = vmul.f32 %v6027_v23, %v7995_v30  ;;  %v6028_v57 = vadd.f32 %v3929_v11, %v2566_v58 }
 0x31a   : > { %v5695_v5 = vpop.f32.mrb[48].mxu1  ;;  %5019 = vst [vmem:[%s8010_s26 + $0x50] sm:$0xff] %v4983_v19   ;;  %v4095_v4 = vadd.f32 %v8000_v36, %v4056_v31  ;;  %v4057_v60 = vmul.f32 %v6028_v57, %v7995_v30 }
 0x31b   : > { %v2577_v62 = vpop.f32.mrb[49].mxu1 }
 0x31c   : > { %v5696_v55 = vpop.f32.mrb[50].mxu1  ;;  %v4096_v56 = vadd.f32 %v8000_v36, %v4057_v60  ;;  %v5983_v32 = vpop.f32.mrb[48].mxu0  ;;  %v4127_v34 = vmax.f32 %v4095_v4, 0.0 }
 0x31d   : > { %v2580_v25 = vpop.f32.mrb[51].mxu1  ;;  %v3940_v9 = vpop.f32.mrb[49].mxu0 }
 0x31e   : > { %v4128_v28 = vmax.f32 %v4096_v56, 0.0  ;;  %v6029_v61 = vadd.f32 %v3940_v9, %v2577_v62  ;;  %v5984_v43 = vpop.f32.mrb[50].mxu0 }
 0x31f   : > { %v3943_v51 = vpop.f32.mrb[51].mxu0 }
 0x320   : > { %v4988_v39 = vpack.c.bf16 %v4128_v28, %v4127_v34  ;;  %v4058_v50 = vmul.f32 %v6029_v61, %v7995_v30  ;;  %v6030_v47 = vadd.f32 %v3943_v51, %v2580_v25 }
 0x322   : > { %v5699_v7 = vpop.f32.mrb[52].mxu1  ;;  %5020 = vst [vmem:[%s8010_s26 + $0x58] sm:$0xff] %v4988_v39   ;;  %v4097_v42 = vadd.f32 %v8000_v36, %v4058_v50  ;;  %v4059_v12 = vmul.f32 %v6030_v47, %v7995_v30 }
 0x323   : > { %v2591_v27 = vpop.f32.mrb[53].mxu1 }
 0x324   : > { %v5700_v59 = vpop.f32.mrb[54].mxu1  ;;  %v4098_v6 = vadd.f32 %v8000_v36, %v4059_v12  ;;  %v5987_v13 = vpop.f32.mrb[52].mxu0  ;;  %v4129_v37 = vmax.f32 %v4097_v42, 0.0 }
 0x325   : > { %v2594_v1 = vpop.f32.mrb[55].mxu1  ;;  %v3954_v24 = vpop.f32.mrb[53].mxu0 }
 0x326   : > { %v4130_v0 = vmax.f32 %v4098_v6, 0.0  ;;  %v6031_v2 = vadd.f32 %v3954_v24, %v2591_v27  ;;  %v5988_v35 = vpop.f32.mrb[54].mxu0 }
 0x327   : > { %v3957_v17 = vpop.f32.mrb[55].mxu0 }
 0x328   : > { %v4993_v22 = vpack.c.bf16 %v4130_v0, %v4129_v37  ;;  %v4060_v41 = vmul.f32 %v6031_v2, %v7995_v30  ;;  %v6032_v49 = vadd.f32 %v3957_v17, %v2594_v1 }
 0x32a   : > { %v5703_v52 = vpop.f32.mrb[56].mxu1  ;;  %5021 = vst [vmem:[%s8010_s26 + $0x60] sm:$0xff] %v4993_v22   ;;  %v4099_v38 = vadd.f32 %v8000_v36, %v4060_v41  ;;  %v4061_v20 = vmul.f32 %v6032_v49, %v7995_v30 }
 0x32b   : > { %v2605_v48 = vpop.f32.mrb[57].mxu1 }
 0x32c   : > { %v5704_v40 = vpop.f32.mrb[58].mxu1  ;;  %v4100_v44 = vadd.f32 %v8000_v36, %v4061_v20  ;;  %v5991_v3 = vpop.f32.mrb[56].mxu0  ;;  %v4131_v26 = vmax.f32 %v4099_v38, 0.0 }
 0x32d   : > { %v2608_v10 = vpop.f32.mrb[59].mxu1  ;;  %v3968_v14 = vpop.f32.mrb[57].mxu0 }
 0x32e   : > { %v4132_v53 = vmax.f32 %v4100_v44, 0.0  ;;  %v6033_v21 = vadd.f32 %v3968_v14, %v2605_v48  ;;  %v5992_v16 = vpop.f32.mrb[58].mxu0 }
 0x32f   : > { %v3971_v54 = vpop.f32.mrb[59].mxu0 }
 0x330   : > { %v4998_v33 = vpack.c.bf16 %v4132_v53, %v4131_v26  ;;  %v4062_v45 = vmul.f32 %v6033_v21, %v7995_v30  ;;  %v6034_v15 = vadd.f32 %v3971_v54, %v2608_v10 }
 0x332   : > { %v5707_v46 = vpop.f32.mrb[60].mxu1  ;;  %5022 = vst [vmem:[%s8010_s26 + $0x68] sm:$0xff] %v4998_v33   ;;  %v4101_v58 = vadd.f32 %v8000_v36, %v4062_v45  ;;  %v4063_v8 = vmul.f32 %v6034_v15, %v7995_v30 }
 0x333   : > { %v2619_v63 = vpop.f32.mrb[61].mxu1 }
 0x334   : > { %v5708_v18 = vpop.f32.mrb[62].mxu1  ;;  %v4102_v23 = vadd.f32 %v8000_v36, %v4063_v8  ;;  %v5995_v29 = vpop.f32.mrb[60].mxu0  ;;  %v4133_v31 = vmax.f32 %v4101_v58, 0.0 }
 0x335   : > { %v2622_v11 = vpop.f32.mrb[63].mxu1  ;;  %v3982_v19 = vpop.f32.mrb[61].mxu0 }
 0x336   : > { %v4134_v57 = vmax.f32 %v4102_v23, 0.0  ;;  %v6035_v5 = vadd.f32 %v3982_v19, %v2619_v63  ;;  %v5996_v4 = vpop.f32.mrb[62].mxu0 }
 0x337   : > { %v3985_v60 = vpop.f32.mrb[63].mxu0 }
 0x338   : > { %v5003_v62 = vpack.c.bf16 %v4134_v57, %v4133_v31  ;;  %v4064_v55 = vmul.f32 %v6035_v5, %v7995_v30  ;;  %v6036_v56 = vadd.f32 %v3985_v60, %v2622_v11 }
 0x33a   : > { %5023 = vst [vmem:[%s8010_s26 + $0x70] sm:$0xff] %v5003_v62   ;;  %v4103_v32 = vadd.f32 %v8000_v36, %v4064_v55  ;;  %v4065_v25 = vmul.f32 %v6036_v56, %v7995_v30 }
 0x33c   : > { %v4104_v9 = vadd.f32 %v8000_v36, %v4065_v25  ;;  %v4135_v34 = vmax.f32 %v4103_v32, 0.0 }
 0x33e   : > { %v4136_v28 = vmax.f32 %v4104_v9, 0.0 }
 0x340   : > { %v5008_v61 = vpack.c.bf16 %v4136_v28, %v4135_v34 }
 0x342   : > { %5024 = vst [vmem:[%s8010_s26 + $0x78] sm:$0xff] %v5008_v61  }
 0x343   : > { %6652 = shalt.err (!%p6649_p3)
}
 0x344   : > { %s6653_s6 = scalar_lea.hbm %s8101_s8, 2048  ;;  %s6657_s21 = scalar_lea.hbm %s8158_s4, 4096 }
 0x345   : > { %p6654_p5 = scmp.ne.s32.totalorder %s8101_s8, %s6653_s6  ;;  %p6658_p9 = scmp.lt.u32.totalorder %s8101_s8, %s8158_s4 }
 0x346   : > { %p6659_p10 = scmp.lt.u32.totalorder %s6657_s21, %s6653_s6  ;;  %p6661_p12 = scmp.lt.u32.totalorder %s6653_s6, %s8101_s8 }
 0x347   : > { %p6655_p6 = pnand %p6654_p5, %p6787_p4 }
 0x348   : > { %p6660_p11 = por %p6659_p10, %p6658_p9 }
 0x349   : > { %p6656_p7 = pneg %p6655_p6 }
 0x34a   : > { %p6662_p13 = por %p6661_p12, %p6660_p11 }
 0x34c   : > { %p6663_p0 = pnand %p6662_p13, %p6656_p7 }
 0x34e   : > { %6666 = shalt.err (!%p6663_p0)
}
 0x34f   : > { %s6720_s26 = smov 64   ;;  %s6721_s29 = smov 4  }
 0x350   : > { %6485 = dma.vmem_to_hbm [thread:$0]  (%p6787_p4), %s8103_s30, 2048, %s8101_s8, %s8108_s9, %s6720_s26, %s6720_s26, %s6721_s29  }
 0x351 PF: > { %p6491_p1 = scmp.ge.s32.totalorder %s6717_s20, 2  ;;  %s4330_s5 = sand.u32 1, %s6697_s15  }
 0x352   : > { %s4331_s7 = scalar_lea.sflag [#allocation3], %s4330_s5 }
 0x353   : > { %p6488_p2 = pnand %p6491_p1, %p6794_p8 }
 0x355   : > { %6692 = dma.done.wait (!%p6488_p2), %s4331_s7, 2048  }
 0x356   : > { %6694 = vsyncadd (!%p6488_p2), %s4331_s7, 4294965248  ;;  %s17_s20 = sadd.s32 1, %s6717_s20   ;;  %s8313_s15 = smov %s6701_s16 }
 0x357   : > { %p14_p3 = scmp.ge.s32.totalorder %s17_s20, 4   ;;  %s8314_s16 = smov %s6705_s17 }
 0x358   : > { %s8315_s17 = smov %s6800_s28  ;;  %s8316_s18 = smov %s6713_s19 }
 0x359   : > { %s8317_s19 = smov %s8319_s23  ;;  %16 = sbr.rel (!%p14_p3) target bundleno = 4 (0x4), region = 86 }
 0x360   :  { %4336 = vsyncpa [#allocation3], 1 }
 0x361   :  { %4338 = vsyncpa [#allocation3 + $0x1], 1 }

</bundles_post_ra>
